<compile_context>
chip_gen: v7x
topology: tpu7x:2x2x1
jax: 0.10.0
libtpu: 0.0.40
codegen_flags: <defaults>
</compile_context>

<pallas_src>
import jax
import jax.numpy as jnp
from jax import lax
from jax.experimental import pallas as pl
from jax.experimental.pallas import tpu as pltpu


def basic_block_kernel(xp_ref, t1_ref, b1_ref, t2_ref, b2_ref, o_ref, mid_ref):
    """Fused conv3x3+BN1+ReLU -> conv3x3+BN2 -> +identity -> ReLU.

    Lane layout: the minor dimension of every tensor is the flattened (w, c)
    pair (W*C lanes, dense unmasked vector ld/st for CIFAR shapes).

    xp_ref : (B, H+2, W*C)   input rows; zero rows at top/bottom (vertical pad).
                             Horizontal padding is folded into the weights.
    t1_ref : (3, W*C, W*C)   conv1 banded-Toeplitz weights (BN1 scale folded),
                             one (K, N) = (W*C, W*C) matrix per kh tap.
    b1_ref : (1, W*C)        BN1 bias, tiled over w.
    t2_ref : (3, W*C, W*C)   conv2 weights (BN2 scale folded).
    b2_ref : (1, W*C)        BN2 bias, tiled over w.
    o_ref  : (B, H, W*C)     output block (lane-dense).
    mid_ref: (B, H+2, W*C)   VMEM scratch: vertically padded conv1 activation.
    """
    B, Hp, WC = xp_ref.shape
    H = Hp - 2

    def conv(src_ref, t_ref, bias_ref):
        # sum_kh  src[:, kh:kh+H, :] @ T[kh]  -- three full-width MXU passes,
        # inputs come straight out of the resident block (no im2col slab).
        acc = jnp.dot(src_ref[:, 0:H, :].reshape(B * H, WC), t_ref[0],
                      preferred_element_type=jnp.float32)
        for kh in (1, 2):
            acc += jnp.dot(src_ref[:, kh:kh + H, :].reshape(B * H, WC), t_ref[kh],
                           preferred_element_type=jnp.float32)
        return acc + bias_ref[...]                      # (B*H, W*C) f32

    # ---- conv1 + BN1 + ReLU -------------------------------------------------
    out1 = jnp.maximum(conv(xp_ref, t1_ref, b1_ref), 0.0)

    # ---- stage vertically padded conv1 activation: zero only the two border
    # rows (done every step, so it stays correct under "parallel" megacore
    # scheduling where steps may land on different cores) ----------------------
    zrow = jnp.zeros((B, 1, WC), mid_ref.dtype)
    mid_ref[:, 0:1, :] = zrow
    mid_ref[:, Hp - 1:Hp, :] = zrow
    mid_ref[:, 1:Hp - 1, :] = out1.reshape(B, H, WC).astype(mid_ref.dtype)

    # ---- conv2 + BN2 + identity shortcut + ReLU ------------------------------
    acc2 = conv(mid_ref, t2_ref, b2_ref)
    shortcut = xp_ref[:, 1:Hp - 1, :].reshape(B * H, WC)   # original x, resident
    res = jnp.maximum(acc2 + shortcut.astype(jnp.float32), 0.0)
    o_ref[...] = res.reshape(B, H, WC).astype(o_ref.dtype)


def _fold_bn(bn, eps):
    gamma, beta, mean, var = bn
    scale = gamma / jnp.sqrt(var + eps)
    bias = beta - mean * scale
    return scale.astype(jnp.float32), bias.astype(jnp.float32)


def _toeplitz_weights(w_oihw, scale, W):
    """Per-kh banded Toeplitz matrices for a 3x3 SAME conv on (w, c)-flat rows.

    T[kh][wq*Ci+ci, w*Co+co] = w[co, ci, kh, wq-w+1] * scale[co]
    when (wq-w+1) in {0,1,2} and wq in [0, W); 0 otherwise (i.e. the horizontal
    SAME padding is folded into the band).  Shape: (3, W*Ci, W*Co).
    """
    Co, Ci, KH, KW = w_oihw.shape
    ws = w_oihw.astype(jnp.float32) * scale[:, None, None, None]
    ts = []
    for kh in range(KH):
        t = jnp.zeros((W * Ci, W * Co), jnp.float32)
        for kw in range(KW):
            band = jnp.eye(W, W, k=1 - kw, dtype=jnp.float32)  # [wq,w]=1 iff wq==w+kw-1
            t = t + jnp.kron(band, ws[:, :, kh, kw].T)
        ts.append(t)
    return jnp.stack(ts)


def _pick_images_per_step(N, per_image_bytes, budget_bytes, min_steps=4):
    """Largest divisor of N fitting the per-step VMEM budget, preferring >= min_steps
    grid steps so v7x's two TensorCores and the double-buffer pipeline get work."""
    divisors = [d for d in range(1, N + 1) if N % d == 0]
    fits = [d for d in divisors if d * per_image_bytes <= budget_bytes] or [1]
    for steps_floor in (min_steps, 2, 1):
        pref = [d for d in fits if N // d >= steps_floor]
        if pref:
            return max(pref)
    return max(fits)


def basic_block_forward(x_nchw, w1, bn1, w2, bn2, eps=1e-5,
                        images_per_step=None, compute_dtype=jnp.float32):
    """x_nchw: (N, C, H, W). w*: (C, C, 3, 3) OIHW. bn*: (gamma, beta, mean, var)."""
    N, C, H, W = x_nchw.shape
    assert w1.shape == (C, C, 3, 3) and w2.shape == (C, C, 3, 3), \
        "only the stride=1, in_planes==planes BasicBlock path is implemented"
    WC = W * C   # 256 for CIFAR shapes (dense lane tiles); other sizes still
                 # correct, just masked on the last lane tile.

    # Input: NCHW -> (N, H, W*C) rows, zero-pad H only (horizontal padding is
    # folded into the weights).  Pure XLA layout plumbing.
    x_rows = jnp.transpose(x_nchw, (0, 2, 3, 1)).reshape(N, H, WC)
    xp = jnp.pad(x_rows, ((0, 0), (1, 1), (0, 0))).astype(compute_dtype)

    # Fold BN scales into the Toeplitz weight columns; biases stay (1, W*C) f32.
    s1, b1 = _fold_bn(bn1, eps)
    s2, b2 = _fold_bn(bn2, eps)
    t1 = _toeplitz_weights(w1, s1, W).astype(compute_dtype)   # (3, WC, WC)
    t2 = _toeplitz_weights(w2, s2, W).astype(compute_dtype)
    b1r = jnp.tile(b1, W).reshape(1, WC)
    b2r = jnp.tile(b2, W).reshape(1, WC)

    if images_per_step is None:
        dsize = jnp.dtype(compute_dtype).itemsize
        # double-buffered input + output blocks + mid scratch, per image
        per_image = (2 * (H + 2) * WC + 2 * H * WC + (H + 2) * WC) * dsize
        # ~6 MiB budget for the batch-dependent part keeps the total (with the
        # ~1.5-3 MiB resident Toeplitz weights) inside the 16 MiB scoped VMEM
        # default on v5e and well under half of v7x's 64 MiB physical VMEM.
        images_per_step = _pick_images_per_step(N, per_image, budget_bytes=6 << 20)
    assert N % images_per_step == 0
    B = images_per_step

    grid_spec = pltpu.PrefetchScalarGridSpec(
        num_scalar_prefetch=0,
        grid=(N // B,),
        in_specs=[
            pl.BlockSpec((B, H + 2, WC), lambda i: (i, 0, 0)),   # padded input rows
            pl.BlockSpec((3, WC, WC), lambda i: (0, 0, 0)),      # conv1 weights (resident)
            pl.BlockSpec((1, WC), lambda i: (0, 0)),             # bn1 bias
            pl.BlockSpec((3, WC, WC), lambda i: (0, 0, 0)),      # conv2 weights (resident)
            pl.BlockSpec((1, WC), lambda i: (0, 0)),             # bn2 bias
        ],
        out_specs=pl.BlockSpec((B, H, WC), lambda i: (i, 0, 0)), # lane-dense output
        scratch_shapes=[pltpu.VMEM((B, H + 2, WC), compute_dtype)],
    )

    out = pl.pallas_call(
        basic_block_kernel,
        out_shape=jax.ShapeDtypeStruct((N, H, WC), compute_dtype),
        grid_spec=grid_spec,
        compiler_params=pltpu.CompilerParams(
            dimension_semantics=("parallel",)),
    )(xp, t1, b1r, t2, b2r)

    # (N, H, W*C) -> NCHW: wrapper-side layout plumbing only.
    return jnp.transpose(out.reshape(N, H, W, C), (0, 3, 1, 2))


def basic_block_reference(x, w1, bn1, w2, bn2, eps=1e-5):
    """Plain-JAX reference matching PyTorch eval-mode semantics (NCHW)."""
    def bn(y, p):
        g, b, m, v = p
        sh = (1, -1, 1, 1)
        return (y - m.reshape(sh)) / jnp.sqrt(v.reshape(sh) + eps) * g.reshape(sh) + b.reshape(sh)

    dn = ('NCHW', 'OIHW', 'NCHW')
    y = lax.conv_general_dilated(x, w1, (1, 1), 'SAME', dimension_numbers=dn)
    y = jnp.maximum(bn(y, bn1), 0.0)
    z = lax.conv_general_dilated(y, w2, (1, 1), 'SAME', dimension_numbers=dn)
    z = bn(z, bn2)
    return jnp.maximum(z + x, 0.0)


if __name__ == "__main__":
    # Shapes consistent with BasicBlock(16, 16, stride=1): identity shortcut.
    N, C, H, W = 2, 16, 16, 16

    key = jax.random.PRNGKey(0)
    k = jax.random.split(key, 8)
    x = jax.random.normal(k[0], (N, C, H, W), jnp.float32)

    # Conv weights (OIHW, no bias); BN params (gamma, beta, running_mean, running_var).
    w1 = jax.random.normal(k[1], (C, C, 3, 3), jnp.float32) * 0.1
    w2 = jax.random.normal(k[2], (C, C, 3, 3), jnp.float32) * 0.1
    bn1 = (1.0 + 0.1 * jax.random.normal(k[3], (C,), jnp.float32),
           0.05 * jax.random.normal(k[4], (C,), jnp.float32),
           0.1 * jax.random.normal(k[5], (C,), jnp.float32),
           1.0 + 0.1 * jax.random.uniform(k[6], (C,), jnp.float32))
    bn2 = (1.0 + 0.1 * jax.random.normal(k[7], (C,), jnp.float32),
           jnp.zeros((C,), jnp.float32),
           jnp.zeros((C,), jnp.float32),
           jnp.ones((C,), jnp.float32))

    ref = jax.block_until_ready(basic_block_reference(x, w1, bn1, w2, bn2))

    # f32 path: tight self-check against the conv reference.
    out = jax.block_until_ready(basic_block_forward(x, w1, bn1, w2, bn2))
    assert out.shape == (N, C, H, W)
    err = float(jnp.max(jnp.abs(out - ref)))
    assert jnp.allclose(out, ref, atol=2e-4, rtol=2e-4), err

    # bf16 storage/MXU path (native-rate MXU on v6e/v7x, f32 accumulation):
    # looser tolerance since inputs/weights/mid are rounded to bf16.
    out_bf16 = jax.block_until_ready(
        basic_block_forward(x, w1, bn1, w2, bn2, compute_dtype=jnp.bfloat16))
    err_bf16 = float(jnp.max(jnp.abs(out_bf16.astype(jnp.float32) - ref)))
    assert jnp.allclose(out_bf16.astype(jnp.float32), ref, atol=1e-1, rtol=1e-1), err_bf16

    print("KERNEL_OK")
</pallas_src>

<mosaic_0001>
module attributes {stable_mosaic.version = 11 : i64} {
  func.func @basic_block_kernel(%arg0: i32, %arg1: memref<1x18x256xf32, #tpu.memory_space<vmem>>, %arg2: memref<3x256x256xf32, #tpu.memory_space<vmem>>, %arg3: memref<1x256xf32, #tpu.memory_space<vmem>>, %arg4: memref<3x256x256xf32, #tpu.memory_space<vmem>>, %arg5: memref<1x256xf32, #tpu.memory_space<vmem>>, %arg6: memref<1x16x256xf32, #tpu.memory_space<vmem>>, %arg7: memref<1x18x256xf32, #tpu.memory_space<vmem>>) attributes {dimension_semantics = [#tpu.dimension_semantics<parallel>], iteration_bounds = array<i64: 2>, scalar_prefetch = 0 : i64, scratch_operands = 1 : i64, tpu.core_type = #tpu.core_type<tc>, window_params = [{transform_indices = @transform_0, window_bounds = array<i64: 1, 18, 256>}, {pipeline_mode = #tpu.pipeline_mode<synchronous>, transform_indices = @transform_1, window_bounds = array<i64: 3, 256, 256>}, {pipeline_mode = #tpu.pipeline_mode<synchronous>, transform_indices = @transform_2, window_bounds = array<i64: 1, 256>}, {pipeline_mode = #tpu.pipeline_mode<synchronous>, transform_indices = @transform_3, window_bounds = array<i64: 3, 256, 256>}, {pipeline_mode = #tpu.pipeline_mode<synchronous>, transform_indices = @transform_4, window_bounds = array<i64: 1, 256>}, {transform_indices = @transform_5, window_bounds = array<i64: 1, 16, 256>}]} {
    %c0 = arith.constant 0 : index
    %c0_0 = arith.constant 0 : index
    %c0_1 = arith.constant 0 : index
    %0 = vector.load %arg1[%c0, %c0_0, %c0_1] : memref<1x18x256xf32, #tpu.memory_space<vmem>>, vector<1x16x256xf32>
    %1 = vector.shape_cast %0 : vector<1x16x256xf32> to vector<16x256xf32>
    %c0_2 = arith.constant 0 : index
    %c0_3 = arith.constant 0 : index
    %c0_4 = arith.constant 0 : index
    %2 = vector.load %arg2[%c0_2, %c0_3, %c0_4] : memref<3x256x256xf32, #tpu.memory_space<vmem>>, vector<1x256x256xf32>
    %3 = vector.shape_cast %2 : vector<1x256x256xf32> to vector<256x256xf32>
    %cst = arith.constant dense<0.000000e+00> : vector<16x256xf32>
    %4 = tpu.matmul %1, %3, %cst {dimension_numbers = #tpu.dot_dimension_numbers<[1], [0], [0], [1], [0, 0, 1, 1], [], []>} : vector<16x256xf32>, vector<256x256xf32>, vector<16x256xf32> -> vector<16x256xf32>
    %c0_5 = arith.constant 0 : index
    %c1 = arith.constant 1 : index
    %c0_6 = arith.constant 0 : index
    %5 = vector.load %arg1[%c0_5, %c1, %c0_6] : memref<1x18x256xf32, #tpu.memory_space<vmem>>, vector<1x16x256xf32>
    %6 = vector.shape_cast %5 : vector<1x16x256xf32> to vector<16x256xf32>
    %c1_7 = arith.constant 1 : index
    %c0_8 = arith.constant 0 : index
    %c0_9 = arith.constant 0 : index
    %7 = vector.load %arg2[%c1_7, %c0_8, %c0_9] : memref<3x256x256xf32, #tpu.memory_space<vmem>>, vector<1x256x256xf32>
    %8 = vector.shape_cast %7 : vector<1x256x256xf32> to vector<256x256xf32>
    %cst_10 = arith.constant dense<0.000000e+00> : vector<16x256xf32>
    %9 = tpu.matmul %6, %8, %cst_10 {dimension_numbers = #tpu.dot_dimension_numbers<[1], [0], [0], [1], [0, 0, 1, 1], [], []>} : vector<16x256xf32>, vector<256x256xf32>, vector<16x256xf32> -> vector<16x256xf32>
    %10 = arith.addf %4, %9 : vector<16x256xf32>
    %c0_11 = arith.constant 0 : index
    %c2 = arith.constant 2 : index
    %c0_12 = arith.constant 0 : index
    %11 = vector.load %arg1[%c0_11, %c2, %c0_12] : memref<1x18x256xf32, #tpu.memory_space<vmem>>, vector<1x16x256xf32>
    %12 = vector.shape_cast %11 : vector<1x16x256xf32> to vector<16x256xf32>
    %c2_13 = arith.constant 2 : index
    %c0_14 = arith.constant 0 : index
    %c0_15 = arith.constant 0 : index
    %13 = vector.load %arg2[%c2_13, %c0_14, %c0_15] : memref<3x256x256xf32, #tpu.memory_space<vmem>>, vector<1x256x256xf32>
    %14 = vector.shape_cast %13 : vector<1x256x256xf32> to vector<256x256xf32>
    %cst_16 = arith.constant dense<0.000000e+00> : vector<16x256xf32>
    %15 = tpu.matmul %12, %14, %cst_16 {dimension_numbers = #tpu.dot_dimension_numbers<[1], [0], [0], [1], [0, 0, 1, 1], [], []>} : vector<16x256xf32>, vector<256x256xf32>, vector<16x256xf32> -> vector<16x256xf32>
    %16 = arith.addf %10, %15 : vector<16x256xf32>
    %c0_17 = arith.constant 0 : index
    %c0_18 = arith.constant 0 : index
    %17 = vector.load %arg3[%c0_17, %c0_18] : memref<1x256xf32, #tpu.memory_space<vmem>>, vector<1x256xf32>
    %18 = vector.broadcast %17 : vector<1x256xf32> to vector<16x256xf32>
    %19 = arith.addf %16, %18 : vector<16x256xf32>
    %cst_19 = arith.constant 0.000000e+00 : f32
    %20 = vector.broadcast %cst_19 : f32 to vector<16x256xf32>
    %21 = arith.maximumf %19, %20 : vector<16x256xf32>
    %cst_20 = arith.constant 0.000000e+00 : f32
    %22 = vector.broadcast %cst_20 : f32 to vector<1x1x256xf32>
    %c0_21 = arith.constant 0 : index
    %c0_22 = arith.constant 0 : index
    %c0_23 = arith.constant 0 : index
    %23 = vector.load %arg7[%c0_21, %c0_22, %c0_23] : memref<1x18x256xf32, #tpu.memory_space<vmem>>, vector<1x1x256xf32>
    tpu.vector_store %arg7[%c0_21, %c0_22, %c0_23], %22 {strides = array<i32>} : memref<1x18x256xf32, #tpu.memory_space<vmem>>, vector<1x1x256xf32>,
    %c0_24 = arith.constant 0 : index
    %c17 = arith.constant 17 : index
    %c0_25 = arith.constant 0 : index
    %24 = vector.load %arg7[%c0_24, %c17, %c0_25] : memref<1x18x256xf32, #tpu.memory_space<vmem>>, vector<1x1x256xf32>
    tpu.vector_store %arg7[%c0_24, %c17, %c0_25], %22 {strides = array<i32>} : memref<1x18x256xf32, #tpu.memory_space<vmem>>, vector<1x1x256xf32>,
    %25 = vector.shape_cast %21 : vector<16x256xf32> to vector<1x16x256xf32>
    %c0_26 = arith.constant 0 : index
    %c1_27 = arith.constant 1 : index
    %c0_28 = arith.constant 0 : index
    %26 = vector.load %arg7[%c0_26, %c1_27, %c0_28] : memref<1x18x256xf32, #tpu.memory_space<vmem>>, vector<1x16x256xf32>
    tpu.vector_store %arg7[%c0_26, %c1_27, %c0_28], %25 {strides = array<i32>} : memref<1x18x256xf32, #tpu.memory_space<vmem>>, vector<1x16x256xf32>,
    %c0_29 = arith.constant 0 : index
    %c0_30 = arith.constant 0 : index
    %c0_31 = arith.constant 0 : index
    %27 = vector.load %arg7[%c0_29, %c0_30, %c0_31] : memref<1x18x256xf32, #tpu.memory_space<vmem>>, vector<1x16x256xf32>
    %28 = vector.shape_cast %27 : vector<1x16x256xf32> to vector<16x256xf32>
    %c0_32 = arith.constant 0 : index
    %c0_33 = arith.constant 0 : index
    %c0_34 = arith.constant 0 : index
    %29 = vector.load %arg4[%c0_32, %c0_33, %c0_34] : memref<3x256x256xf32, #tpu.memory_space<vmem>>, vector<1x256x256xf32>
    %30 = vector.shape_cast %29 : vector<1x256x256xf32> to vector<256x256xf32>
    %cst_35 = arith.constant dense<0.000000e+00> : vector<16x256xf32>
    %31 = tpu.matmul %28, %30, %cst_35 {dimension_numbers = #tpu.dot_dimension_numbers<[1], [0], [0], [1], [0, 0, 1, 1], [], []>} : vector<16x256xf32>, vector<256x256xf32>, vector<16x256xf32> -> vector<16x256xf32>
    %c0_36 = arith.constant 0 : index
    %c1_37 = arith.constant 1 : index
    %c0_38 = arith.constant 0 : index
    %32 = vector.load %arg7[%c0_36, %c1_37, %c0_38] : memref<1x18x256xf32, #tpu.memory_space<vmem>>, vector<1x16x256xf32>
    %33 = vector.shape_cast %32 : vector<1x16x256xf32> to vector<16x256xf32>
    %c1_39 = arith.constant 1 : index
    %c0_40 = arith.constant 0 : index
    %c0_41 = arith.constant 0 : index
    %34 = vector.load %arg4[%c1_39, %c0_40, %c0_41] : memref<3x256x256xf32, #tpu.memory_space<vmem>>, vector<1x256x256xf32>
    %35 = vector.shape_cast %34 : vector<1x256x256xf32> to vector<256x256xf32>
    %cst_42 = arith.constant dense<0.000000e+00> : vector<16x256xf32>
    %36 = tpu.matmul %33, %35, %cst_42 {dimension_numbers = #tpu.dot_dimension_numbers<[1], [0], [0], [1], [0, 0, 1, 1], [], []>} : vector<16x256xf32>, vector<256x256xf32>, vector<16x256xf32> -> vector<16x256xf32>
    %37 = arith.addf %31, %36 : vector<16x256xf32>
    %c0_43 = arith.constant 0 : index
    %c2_44 = arith.constant 2 : index
    %c0_45 = arith.constant 0 : index
    %38 = vector.load %arg7[%c0_43, %c2_44, %c0_45] : memref<1x18x256xf32, #tpu.memory_space<vmem>>, vector<1x16x256xf32>
    %39 = vector.shape_cast %38 : vector<1x16x256xf32> to vector<16x256xf32>
    %c2_46 = arith.constant 2 : index
    %c0_47 = arith.constant 0 : index
    %c0_48 = arith.constant 0 : index
    %40 = vector.load %arg4[%c2_46, %c0_47, %c0_48] : memref<3x256x256xf32, #tpu.memory_space<vmem>>, vector<1x256x256xf32>
    %41 = vector.shape_cast %40 : vector<1x256x256xf32> to vector<256x256xf32>
    %cst_49 = arith.constant dense<0.000000e+00> : vector<16x256xf32>
    %42 = tpu.matmul %39, %41, %cst_49 {dimension_numbers = #tpu.dot_dimension_numbers<[1], [0], [0], [1], [0, 0, 1, 1], [], []>} : vector<16x256xf32>, vector<256x256xf32>, vector<16x256xf32> -> vector<16x256xf32>
    %43 = arith.addf %37, %42 : vector<16x256xf32>
    %c0_50 = arith.constant 0 : index
    %c0_51 = arith.constant 0 : index
    %44 = vector.load %arg5[%c0_50, %c0_51] : memref<1x256xf32, #tpu.memory_space<vmem>>, vector<1x256xf32>
    %45 = vector.broadcast %44 : vector<1x256xf32> to vector<16x256xf32>
    %46 = arith.addf %43, %45 : vector<16x256xf32>
    %c0_52 = arith.constant 0 : index
    %c1_53 = arith.constant 1 : index
    %c0_54 = arith.constant 0 : index
    %47 = vector.load %arg1[%c0_52, %c1_53, %c0_54] : memref<1x18x256xf32, #tpu.memory_space<vmem>>, vector<1x16x256xf32>
    %48 = vector.shape_cast %47 : vector<1x16x256xf32> to vector<16x256xf32>
    %49 = arith.addf %46, %48 : vector<16x256xf32>
    %cst_55 = arith.constant 0.000000e+00 : f32
    %50 = vector.broadcast %cst_55 : f32 to vector<16x256xf32>
    %51 = arith.maximumf %49, %50 : vector<16x256xf32>
    %52 = vector.shape_cast %51 : vector<16x256xf32> to vector<1x16x256xf32>
    %c0_56 = arith.constant 0 : index
    %c0_57 = arith.constant 0 : index
    %c0_58 = arith.constant 0 : index
    %53 = vector.load %arg6[%c0_56, %c0_57, %c0_58] : memref<1x16x256xf32, #tpu.memory_space<vmem>>, vector<1x16x256xf32>
    tpu.vector_store %arg6[%c0_56, %c0_57, %c0_58], %52 {strides = array<i32>} : memref<1x16x256xf32, #tpu.memory_space<vmem>>, vector<1x16x256xf32>,
    return
  }
  func.func @transform_0(%arg0: i32) -> (i32, i32, i32) {
    %c0_i32 = arith.constant 0 : i32
    %c0_i32_0 = arith.constant 0 : i32
    %c0_i32_1 = arith.constant 0 : i32
    return %arg0, %c0_i32, %c0_i32_0 : i32, i32, i32
  }
  func.func @transform_1(%arg0: i32) -> (i32, i32, i32) {
    %c0_i32 = arith.constant 0 : i32
    %c0_i32_0 = arith.constant 0 : i32
    %c0_i32_1 = arith.constant 0 : i32
    %c0_i32_2 = arith.constant 0 : i32
    return %c0_i32, %c0_i32_0, %c0_i32_1 : i32, i32, i32
  }
  func.func @transform_2(%arg0: i32) -> (i32, i32) {
    %c0_i32 = arith.constant 0 : i32
    %c0_i32_0 = arith.constant 0 : i32
    %c0_i32_1 = arith.constant 0 : i32
    return %c0_i32, %c0_i32_0 : i32, i32
  }
  func.func @transform_3(%arg0: i32) -> (i32, i32, i32) {
    %c0_i32 = arith.constant 0 : i32
    %c0_i32_0 = arith.constant 0 : i32
    %c0_i32_1 = arith.constant 0 : i32
    %c0_i32_2 = arith.constant 0 : i32
    return %c0_i32, %c0_i32_0, %c0_i32_1 : i32, i32, i32
  }
  func.func @transform_4(%arg0: i32) -> (i32, i32) {
    %c0_i32 = arith.constant 0 : i32
    %c0_i32_0 = arith.constant 0 : i32
    %c0_i32_1 = arith.constant 0 : i32
    return %c0_i32, %c0_i32_0 : i32, i32
  }
  func.func @transform_5(%arg0: i32) -> (i32, i32, i32) {
    %c0_i32 = arith.constant 0 : i32
    %c0_i32_0 = arith.constant 0 : i32
    %c0_i32_1 = arith.constant 0 : i32
    return %arg0, %c0_i32, %c0_i32_0 : i32, i32, i32
  }
}

</mosaic_0001>

<bundles_post_ra>
// kernel: tpu_custom_call.1
= control target key start
LH: loop header
LB: loop body
LE: loop exit
PB: predicated region body
PF: predicated region fallthrough
CT: control target
= control target key end

     0   :  { %10 = vsyncpa [#allocation4], 0  ;;  %s2334_s0 = inlined_call_operand.vmem [shape: f32[2,18,256], index: 0, kind: input, shape index: {}]   ;;  %s2335_s1 = inlined_call_operand.hbm [shape: f32[3,256,256], index: 1, kind: input, shape index: {}]   ;;  %s2336_s2 = inlined_call_operand.vmem [shape: f32[1,256], index: 2, kind: input, shape index: {}]   ;;  %s2337_s3 = inlined_call_operand.hbm [shape: f32[3,256,256], index: 3, kind: input, shape index: {}]   ;;  %s2338_s4 = inlined_call_operand.vmem [shape: f32[1,256], index: 4, kind: input, shape index: {}]   ;;  %s2339_s5 = inlined_call_operand.hbm [shape: f32[2,16,256], index: 5, kind: output, shape index: {}]  }
   0x1   :  { %11 = vsyncpa [#allocation7], 0 }
   0x2   :  { %12 = vsyncpa [#allocation5], 0 }
   0x3   :  { %14 = vsyncpa [#allocation5 + $0x1], 0  ;;  %s2065_s18 = smov 0   ;;  %s2067_s19 = smov 0  }
   0x4   :  { %s2069_s20 = smov 0   ;;  %s2071_s21 = smov 0  }
   0x5 LB: > { %s2086_s22 = sadd.s32 4294967295, %s2025_s21   ;;  %s1417_s23 = sadd.s32 4294967294, %s2025_s21   ;;  %s2025_s21 = sphi %s2071_s21, %s2357_s21   ;;  %s2021_s20 = sphi %s2069_s20, %s2356_s20   ;;  %s2017_s19 = sphi %s2067_s19, %s2355_s19   ;;  %s2013_s18 = sphi %s2065_s18, %s2354_s18  }
   0x6   : > { %s2090_s24 = sadd.s32 1, %s2025_s21   ;;  %s137_s25 = sadd.s32 1, %s2021_s20 }
   0x7   : > { %s134_s26 = ssub.s32 %s2025_s21, %s2090_s24  ;;  %p147_p0 = scmp.ne.s32.totalorder %s2021_s20, %s2017_s19 }
   0x8   : > { %p135_p1 = scmp.eq.s32.totalorder %s134_s26, 0  ;;  %p148_p2 = scmp.eq.s32.totalorder %s2086_s22, 1 }
   0x9   : > { %p153_p3 = scmp.ne.s32.totalorder %s2017_s19, %s2013_s18  ;;  %p154_p4 = scmp.eq.s32.totalorder %s1417_s23, 1 }
   0xa   : > { %s2101_s27 = scalar_select %p135_p1, %s2021_s20, %s137_s25  }
   0xb   : > { %p2103_p5 = por %p148_p2, %p147_p0  ;;  %p2107_p6 = por %p154_p4, %p153_p3 }
   0xc   : > { %p1418_p7 = scmp.ge.s32.totalorder %s2025_s21, 1  ;;  %p161_p8 = scmp.lt.s32.totalorder %s2025_s21, 3 }
   0xd   : > { %s2343_s28 = scalar_select %p2103_p5, 1, 0 }
   0xe   : > { %s2344_s29 = scalar_select %p2107_p6, 1, 0 }
   0xf   : > { %p2340_p9 = scmp.eq.s32.totalorder %s2086_s22, 0  ;;  %p2114_p10 = pnand %p1418_p7, %p161_p8 }
  0x10   : > { %s2027_s6 = smov [#allocation3]   ;;  %s2028_s9 = smov [#allocation6]  }
  0x11   : > { %s2345_s30 = scalar_select %p2114_p10, 1, 0 }
  0x12   : > { %s173_s7 = sshll.u32 %s2027_s6, 4  ;;  %p1844_p11 = pneg %p2114_p10  ;;  %s174_s7 = int_to_ptr.vmem [resolvable:$true] %s173_s7 }
  0x13   : > { %s189_s10 = sshll.u32 %s2028_s9, 4  ;;  %s1899_s13 = scalar_lea.hbm %s2335_s1, 24576  ;;  %s2126_s10 = int_to_ptr.vmem [resolvable:$true] %s189_s10 }
  0x14   : > { %p2122_p12 = pnand %p2340_p9, %p1844_p11  ;;  %p1900_p13 = scmp.ne.s32.totalorder %s2335_s1, %s1899_s13 }
  0x15   : > { %p1906_p3 = scmp.lt.u32.totalorder %s1899_s13, %s2335_s1 }
  0x16   : > { %p1901_p0 = pneg %p2122_p12 }
  0x18   : > { %p1902_p1 = pnand %p1901_p0, %p1900_p13 }
  0x1a   : > { %p1903_p2 = pneg %p1902_p1 }
  0x1c   : > { %p1908_p4 = pnand %p1906_p3, %p1903_p2 }
  0x1e   : > { %1911 = shalt.err (!%p1908_p4)
}
  0x1f   : > { %s1912_s23 = scalar_lea.vmem %s174_s7, 24576  ;;  %p1920_p9 = scmp.lt.s32.totalorder %s174_s7, %s174_s7 }
  0x20   : > { %p1913_p7 = scmp.ne.s32.totalorder %s174_s7, %s1912_s23  ;;  %p1921_p6 = scmp.lt.s32.totalorder %s1912_s23, %s1912_s23 }
  0x22   : > { %p1915_p8 = pnand %p1913_p7, %p1901_p0  ;;  %p1922_p5 = por %p1921_p6, %p1920_p9 }
  0x24   : > { %p1916_p11 = pneg %p1915_p8 }
  0x26   : > { %p1923_p10 = pnand %p1922_p5, %p1916_p11 }
  0x28   : > { %1926 = shalt.err (!%p1923_p10)
}
  0x29   : > { %s2029_s25 = smov 256   ;;  %s2030_s26 = smov 16  }
  0x2a   : > { %1847 = dma.hbm_to_vmem [thread:$0]  (!%p2122_p12), %s2335_s1, 24576, %s174_s7, [#allocation4], %s2029_s25, %s2029_s25, %s2030_s26  }
  0x2b   : > { %s1927_s13 = scalar_lea.hbm %s2337_s3, 24576 }
  0x2c   : > { %p1928_p13 = scmp.ne.s32.totalorder %s2337_s3, %s1927_s13  ;;  %p1934_p9 = scmp.lt.u32.totalorder %s1927_s13, %s2337_s3 }
  0x2e   : > { %p1930_p5 = pnand %p1928_p13, %p1901_p0 }
  0x30   : > { %p1931_p6 = pneg %p1930_p5 }
  0x32   : > { %p1936_p10 = pnand %p1934_p9, %p1931_p6 }
  0x34   : > { %1939 = shalt.err (!%p1936_p10)
}
  0x35   : > { %s1940_s7 = scalar_lea.vmem %s2126_s10, 24576  ;;  %p1948_p4 = scmp.lt.s32.totalorder %s2126_s10, %s2126_s10 }
  0x36   : > { %p1941_p1 = scmp.ne.s32.totalorder %s2126_s10, %s1940_s7  ;;  %p1949_p7 = scmp.lt.s32.totalorder %s1940_s7, %s1940_s7 }
  0x38   : > { %p1943_p2 = pnand %p1941_p1, %p1901_p0  ;;  %p1950_p8 = por %p1949_p7, %p1948_p4 }
  0x3a   : > { %p1944_p3 = pneg %p1943_p2 }
  0x3c   : > { %p1951_p11 = pnand %p1950_p8, %p1944_p3 }
  0x3e   : > { %1954 = shalt.err (!%p1951_p11)
}
  0x3f   : > { %1850 = dma.hbm_to_vmem [thread:$0]  (!%p2122_p12), %s2337_s3, 24576, %s2126_s10, [#allocation7], %s2029_s25, %s2029_s25, %s2030_s26  }
  0x40   : > { %p2347_p13 = scmp.ne.s32.totalorder %s2345_s30, 0 }
  0x41   : > { %p2348_p5 = scmp.eq.s32.totalorder (!%p2347_p13), %s2086_s22, 0 }
  0x42   : > { %216 = sbr.rel (%p2347_p13) target bundleno = 870 (0x366), region = 40 }
  0x49   : > { %2000 = dma.done.wait (%p2348_p5), [#allocation4], 24576   ;;  %p2349_p0 = pmov %p2348_p5 }
  0x4b   : > { %2002 = vsyncadd (%p2349_p0), [#allocation4], 4294942720  ;;  %p2350_p6 = pmov %p2349_p0 }
  0x4c   : > { %p2351_p9 = pmov %p2349_p0 }
  0x4d   : > { %2004 = dma.done.wait (%p2350_p6), [#allocation7], 24576  }
  0x4e   : > { %2006 = vsyncadd (%p2351_p9), [#allocation7], 4294942720  ;;  %v327_v0 = vld [vmem:[#allocation3 + $0x208] sm:$0xff]  ;;  %v329_v1 = vld [vmem:[#allocation3 + $0x218] sm:$0xff]  ;;  %p248_p12 = scmp.lt.s32.totalorder %s2086_s22, 1  ;;  %vm396_vm0 = vcmask 1046528  }
  0x4f   : > { %v326_v2 = vld [vmem:[#allocation3 + $0x200] sm:$0xff]  ;;  %v1433_v3 = vpack.c.bf16 %v329_v1, %v327_v0  ;;  %v328_v4 = vld [vmem:[#allocation3 + $0x210] sm:$0xff]  ;;  %v331_v5 = vld [vmem:[#allocation3 + $0x228] sm:$0xff]  ;;  %vm638_vm1 = vcmask 1045504   ;;  %vm767_vm3 = vcmask 1040384   ;;  %s245_s14 = sand.u32 1, %s2017_s19  }
  0x50   : > { %v333_v6 = vld [vmem:[#allocation3 + $0x238] sm:$0xff]  ;;  %v1435_v7 = vpack.c.bf16 %v328_v4, %v326_v2  ;;  %v330_v9 = vld [vmem:[#allocation3 + $0x220] sm:$0xff]  ;;  %v332_v10 = vld [vmem:[#allocation3 + $0x230] sm:$0xff]  ;;  %s249_s30 = scalar_select %p248_p12, %s2086_s22, 1 }
  0x51   : > { %v1437_v8 = vpack.c.bf16 %v333_v6, %v331_v5  ;;  %v335_v11 = vld [vmem:[#allocation3 + $0x248] sm:$0xff]  ;;  %1434 = vmatprep.subr.bf16.mxu0 %v1433_v3  ;;  %v337_v12 = vld [vmem:[#allocation3 + $0x258] sm:$0xff]  ;;  %v1439_v13 = vpack.c.bf16 %v332_v10, %v330_v9  ;;  %v334_v15 = vld [vmem:[#allocation3 + $0x240] sm:$0xff]  ;;  %s1425_s15 = sshll.u32 %s245_s14, 5  ;;  %s1432_s7 = sshll.u32 %s2086_s22, 9 }
  0x52   : > { %1436 = vmatpush1.bf16.msra.mxu0 %v1435_v7  ;;  %v1441_v14 = vpack.c.bf16 %v337_v12, %v335_v11  ;;  %v336_v16 = vld [vmem:[#allocation3 + $0x250] sm:$0xff]  ;;  %v339_v17 = vld [vmem:[#allocation3 + $0x268] sm:$0xff]  ;;  %v341_v18 = vld [vmem:[#allocation3 + $0x278] sm:$0xff]  ;;  %s1833_s8 = smul.u32 48, %s249_s30  ;;  %s247_s16 = scalar_lea.vmem [#allocation8], %s1425_s15 }
  0x53   : > { %1438 = vmatprep.subr.bf16.mxu0 %v1437_v8  ;;  %v1443_v19 = vpack.c.bf16 %v336_v16, %v334_v15  ;;  %v1445_v20 = vpack.c.bf16 %v341_v18, %v339_v17  ;;  %v338_v21 = vld [vmem:[#allocation3 + $0x260] sm:$0xff]  ;;  %v340_v22 = vld [vmem:[#allocation3 + $0x270] sm:$0xff]  ;;  %v343_v23 = vld [vmem:[#allocation3 + $0x288] sm:$0xff]  ;;  %s1333_s17 = sshll.u32 %s247_s16, 4  ;;  %s2289_s30 = scalar_lea.hbm %s2339_s5, %s1432_s7  ;;  %s2284_s17 = int_to_ptr.vmem [resolvable:$true] %s1333_s17 }
  0x54   : > { %v345_v24 = vld [vmem:[#allocation3 + $0x298] sm:$0xff]  ;;  %v1447_v25 = vpack.c.bf16 %v340_v22, %v338_v21  ;;  %v342_v27 = vld [vmem:[#allocation3 + $0x280] sm:$0xff]  ;;  %v344_v28 = vld [vmem:[#allocation3 + $0x290] sm:$0xff]  ;;  %s2190_s26 = scalar_lea.vmem %s2334_s0, %s1833_s8  ;;  %s2293_s8 = scalar_lea.sflag [#allocation5], %s245_s14 }
  0x55   : > { %v1449_v26 = vpack.c.bf16 %v345_v24, %v343_v23  ;;  %v347_v29 = vld [vmem:[#allocation3 + $0x2a8] sm:$0xff]  ;;  %v349_v30 = vld [vmem:[#allocation3 + $0x2b8] sm:$0xff]  ;;  %v1451_v31 = vpack.c.bf16 %v344_v28, %v342_v27  ;;  %v346_v33 = vld [vmem:[#allocation3 + $0x2a0] sm:$0xff]  ;;  %s1955_s22 = scalar_lea.vmem %s2284_s17, 512  ;;  %p2352_p1 = scmp.ne.s32.totalorder %s2343_s28, 0 }
  0x56   : > { %1440 = vmatpush1.bf16.msra.mxu0 %v1439_v13  ;;  %v1453_v32 = vpack.c.bf16 %v349_v30, %v347_v29  ;;  %v348_v34 = vld [vmem:[#allocation3 + $0x2b0] sm:$0xff]  ;;  %v351_v35 = vld [vmem:[#allocation3 + $0x2c8] sm:$0xff]  ;;  %v353_v36 = vld [vmem:[#allocation3 + $0x2d8] sm:$0xff]  ;;  %p1956_p10 = scmp.ne.s32.totalorder %s2284_s17, %s1955_s22  ;;  %s2032_s10 = smov [#allocation8]  }
  0x57   : > { %1442 = vmatprep.subr.bf16.mxu0 %v1441_v14  ;;  %v1455_v37 = vpack.c.bf16 %v348_v34, %v346_v33  ;;  %v350_v38 = vld [vmem:[#allocation3 + $0x2c0] sm:$0xff]  ;;  %v1457_v39 = vpack.c.bf16 %v353_v36, %v351_v35  ;;  %v352_v40 = vld [vmem:[#allocation3 + $0x2d0] sm:$0xff]  ;;  %v2193_v41 = vld [vmem:[%s2190_s26 + $0x18] sm:$0xff]  ;;  %s1959_s25 = sshll.u32 %s2032_s10, 4  ;;  %s1960_s25 = int_to_ptr.vmem [resolvable:$false] %s1959_s25 }
  0x58   : > { %v322_v42 = vld [vmem:[%s2190_s26 + $0x8] sm:$0xfe]  ;;  %v355_v43 = vld [vmem:[#allocation3 + $0x2e8] sm:$0xff]  ;;  %v401_v46 = vrot.slane %v2193_v41, 1  ;;  %v1459_v47 = vpack.c.bf16 %v352_v40, %v350_v38  ;;  %v354_v50 = vld [vmem:[#allocation3 + $0x2e0] sm:$0xff]  ;;  %p1957_p2 = pnand %p1956_p10, %p2352_p1  ;;  %p1962_p4 = scmp.lt.s32.totalorder %s2284_s17, %s1960_s25 }
  0x59   : > { %v357_v44 = vld [vmem:[#allocation3 + $0x2f8] sm:$0xff]  ;;  %v400_v45 = vrot.slane %v322_v42, 1  ;;  %v356_v51 = vld [vmem:[#allocation3 + $0x2f0] sm:$0xff]  ;;  %v359_v52 = vld [vmem:[#allocation3 + $0x308] sm:$0xff] }
  0x5a   : > { %1444 = vmatpush1.bf16.msra.mxu0 %v1443_v19  ;;  %v1461_v49 = vpack.c.bf16 %v357_v44, %v355_v43  ;;  %v361_v53 = vld [vmem:[#allocation3 + $0x318] sm:$0xff]  ;;  %v1463_v54 = vpack.c.bf16 %v356_v51, %v354_v50  ;;  %v358_v56 = vld [vmem:[#allocation3 + $0x300] sm:$0xff]  ;;  %v360_v57 = vld [vmem:[#allocation3 + $0x310] sm:$0xff]  ;;  %p1958_p3 = pneg %p1957_p2 }
  0x5b   : > { %1446 = vmatprep.subr.bf16.mxu0 %v1445_v20  ;;  %v402_v48 = vsel %vm396_vm0, %v400_v45, %v401_v46  ;;  %v1465_v55 = vpack.c.bf16 %v361_v53, %v359_v52  ;;  %v363_v58 = vld [vmem:[#allocation3 + $0x328] sm:$0xff]  ;;  %v365_v59 = vld [vmem:[#allocation3 + $0x338] sm:$0xff]  ;;  %v1467_v60 = vpack.c.bf16 %v360_v57, %v358_v56  ;;  %v362_v62 = vld [vmem:[#allocation3 + $0x320] sm:$0xff] }
  0x5c   : > { %475 = vmatprep.mubr.f32.mxu0 %v402_v48  ;;  %v1469_v61 = vpack.c.bf16 %v365_v59, %v363_v58  ;;  %v364_v63 = vld [vmem:[#allocation3 + $0x330] sm:$0xff]  ;;  %v367_v0 = vld [vmem:[#allocation3 + $0x348] sm:$0xff]  ;;  %v369_v1 = vld [vmem:[#allocation3 + $0x358] sm:$0xff] }
  0x5d   : > { %v1471_v2 = vpack.c.bf16 %v364_v63, %v362_v62  ;;  %v1473_v3 = vpack.c.bf16 %v369_v1, %v367_v0  ;;  %v366_v4 = vld [vmem:[#allocation3 + $0x340] sm:$0xff]  ;;  %v368_v5 = vld [vmem:[#allocation3 + $0x350] sm:$0xff]  ;;  %v371_v6 = vld [vmem:[#allocation3 + $0x368] sm:$0xff] }
  0x5e   : > { %1448 = vmatpush1.bf16.msra.mxu0 %v1447_v25  ;;  %v373_v7 = vld [vmem:[#allocation3 + $0x378] sm:$0xff]  ;;  %v1475_v8 = vpack.c.bf16 %v368_v5, %v366_v4  ;;  %v370_v10 = vld [vmem:[#allocation3 + $0x360] sm:$0xff]  ;;  %v372_v11 = vld [vmem:[#allocation3 + $0x370] sm:$0xff] }
  0x5f   : > { %1450 = vmatprep.subr.bf16.mxu0 %v1449_v26  ;;  %v1477_v9 = vpack.c.bf16 %v373_v7, %v371_v6  ;;  %v375_v12 = vld [vmem:[#allocation3 + $0x388] sm:$0xff]  ;;  %v377_v13 = vld [vmem:[#allocation3 + $0x398] sm:$0xff]  ;;  %v1479_v14 = vpack.c.bf16 %v372_v11, %v370_v10  ;;  %v374_v16 = vld [vmem:[#allocation3 + $0x380] sm:$0xff] }
  0x60   : > { %v1481_v15 = vpack.c.bf16 %v377_v13, %v375_v12  ;;  %v376_v17 = vld [vmem:[#allocation3 + $0x390] sm:$0xff]  ;;  %v379_v18 = vld [vmem:[#allocation3 + $0x3a8] sm:$0xff]  ;;  %v381_v19 = vld [vmem:[#allocation3 + $0x3b8] sm:$0xff] }
  0x61   : > { %v1483_v20 = vpack.c.bf16 %v376_v17, %v374_v16  ;;  %v1485_v21 = vpack.c.bf16 %v381_v19, %v379_v18  ;;  %v378_v22 = vld [vmem:[#allocation3 + $0x3a0] sm:$0xff]  ;;  %v380_v23 = vld [vmem:[#allocation3 + $0x3b0] sm:$0xff]  ;;  %v383_v24 = vld [vmem:[#allocation3 + $0x3c8] sm:$0xff] }
  0x62   : > { %1452 = vmatpush1.bf16.msra.mxu0 %v1451_v31  ;;  %v385_v25 = vld [vmem:[#allocation3 + $0x3d8] sm:$0xff]  ;;  %v1487_v26 = vpack.c.bf16 %v380_v23, %v378_v22  ;;  %v382_v28 = vld [vmem:[#allocation3 + $0x3c0] sm:$0xff]  ;;  %v384_v29 = vld [vmem:[#allocation3 + $0x3d0] sm:$0xff] }
  0x63   : > { %1454 = vmatprep.subr.bf16.mxu0 %v1453_v32  ;;  %v1489_v27 = vpack.c.bf16 %v385_v25, %v383_v24  ;;  %v387_v30 = vld [vmem:[#allocation3 + $0x3e8] sm:$0xff]  ;;  %v389_v31 = vld [vmem:[#allocation3 + $0x3f8] sm:$0xff]  ;;  %v1491_v32 = vpack.c.bf16 %v384_v29, %v382_v28  ;;  %v386_v33 = vld [vmem:[#allocation3 + $0x3e0] sm:$0xff] }
  0x64   : > { %v1493_v34 = vpack.c.bf16 %v389_v31, %v387_v30  ;;  %v388_v35 = vld [vmem:[#allocation3 + $0x3f0] sm:$0xff]  ;;  %v2201_v36 = vld [vmem:[%s2190_s26 + $0x10] sm:$0xff]  ;;  %v258_v38 = vld [vmem:[#allocation3 + $0x8] sm:$0xff] }
  0x65   : > { %v324_v40 = vld [vmem:[%s2190_s26 + $0x28] sm:$0x1]  ;;  %v1495_v42 = vpack.c.bf16 %v388_v35, %v386_v33  ;;  %v398_v44 = vrot.slane %v2201_v36, 1  ;;  %v259_v48 = vld [vmem:[#allocation3 + $0x10] sm:$0xff]  ;;  %v262_v51 = vld [vmem:[#allocation3 + $0x28] sm:$0xff] }
  0x66   : > { %1456 = vmatpush1.bf16.msra.mxu0 %v1455_v37  ;;  %v321_v37 = vld [vmem:[%s2190_s26] sm:$0xfe]  ;;  %v323_v50 = vld [vmem:[%s2190_s26 + $0x20] sm:$0x1]  ;;  %v264_v52 = vld [vmem:[#allocation3 + $0x38] sm:$0xff] }
  0x67   : > { %1458 = vmatprep.subr.bf16.mxu0 %v1457_v39  ;;  %v260_v39 = vld [vmem:[#allocation3 + $0x18] sm:$0xff]  ;;  %v397_v43 = vrot.slane %v321_v37, 1  ;;  %v1501_v56 = vpack.c.bf16 %v264_v52, %v262_v51  ;;  %v261_v57 = vld [vmem:[#allocation3 + $0x20] sm:$0xff]  ;;  %v263_v58 = vld [vmem:[#allocation3 + $0x30] sm:$0xff] }
  0x68   : > { %v1497_v45 = vpack.c.bf16 %v260_v39, %v258_v38  ;;  %v1503_v62 = vpack.c.bf16 %v263_v58, %v261_v57  ;;  %v265_v1 = vld [vmem:[#allocation3 + $0x40] sm:$0xff]  ;;  %v270_v4 = vld [vmem:[#allocation3 + $0x68] sm:$0xff]  ;;  %v272_v5 = vld [vmem:[#allocation3 + $0x78] sm:$0xff] }
  0x69   : > { %v399_v53 = vsel %vm396_vm0, %v397_v43, %v398_v44  ;;  %v269_v6 = vld [vmem:[#allocation3 + $0x60] sm:$0xff]  ;;  %v271_v7 = vld [vmem:[#allocation3 + $0x70] sm:$0xff]  ;;  %v864_v13 = vld [vmem:[#allocation6 + $0x228] sm:$0xff] }
  0x6a   : > { %1460 = vmatpush1.bf16.msra.mxu0 %v1459_v47  ;;  %v257_v47 = vld [vmem:[#allocation3] sm:$0xff]  ;;  %v861_v12 = vld [vmem:[#allocation6 + $0x210] sm:$0xff]  ;;  %v276_v22 = vld [vmem:[#allocation3 + $0x98] sm:$0xff]  ;;  %v1511_v25 = vpack.c.bf16 %v271_v7, %v269_v6 }
  0x6b   : > { %1462 = vmatprep.subr.bf16.mxu0 %v1461_v49  ;;  %v405_v49 = vrot.slane %v324_v40, 1  ;;  %v863_v18 = vld [vmem:[#allocation6 + $0x220] sm:$0xff]  ;;  %v865_v19 = vld [vmem:[#allocation6 + $0x230] sm:$0xff]  ;;  %v870_v23 = vld [vmem:[#allocation6 + $0x258] sm:$0xff] }
  0x6c   : > { %v1631_v24 = vpack.c.bf16 %v865_v19, %v863_v18  ;;  %v867_v28 = vld [vmem:[#allocation6 + $0x240] sm:$0xff]  ;;  %v869_v29 = vld [vmem:[#allocation6 + $0x250] sm:$0xff]  ;;  %v874_v33 = vld [vmem:[#allocation6 + $0x278] sm:$0xff] }
  0x6d   : > { %v406_v59 = vsel %vm396_vm0, %v401_v46, %v405_v49  ;;  %v862_v46 = vld [vmem:[#allocation6 + $0x218] sm:$0xff]  ;;  %v275_v31 = vld [vmem:[#allocation3 + $0x90] sm:$0xff]  ;;  %v1635_v37 = vpack.c.bf16 %v869_v29, %v867_v28  ;;  %v277_v39 = vld [vmem:[#allocation3 + $0xa0] sm:$0xff] }
  0x6e   : > { %1464 = vmatpush1.bf16.msra.mxu0 %v1463_v54  ;;  %v1499_v54 = vpack.c.bf16 %v259_v48, %v257_v47  ;;  %v280_v35 = vld [vmem:[#allocation3 + $0xb8] sm:$0xff]  ;;  %v873_v43 = vld [vmem:[#allocation6 + $0x270] sm:$0xff]  ;;  %v876_v47 = vld [vmem:[#allocation6 + $0x288] sm:$0xff] }
  0x6f   : > { %1466 = vmatprep.subr.bf16.mxu0 %v1465_v55  ;;  %v403_v55 = vrot.slane %v323_v50, 1  ;;  %v878_v48 = vld [vmem:[#allocation6 + $0x298] sm:$0xff]  ;;  %v282_v49 = vld [vmem:[#allocation3 + $0xc8] sm:$0xff]  ;;  %v283_v58 = vld [vmem:[#allocation3 + $0xd0] sm:$0xff] }
  0x70   : > { %v284_v50 = vld [vmem:[#allocation3 + $0xd8] sm:$0xff]  ;;  %v287_v6 = vld [vmem:[#allocation3 + $0xf0] sm:$0xff]  ;;  %v884_v7 = vld [vmem:[#allocation6 + $0x2c8] sm:$0xff] }
  0x71   : > { %v404_v63 = vsel %vm396_vm0, %v398_v44, %v403_v55  ;;  %v875_v55 = vld [vmem:[#allocation6 + $0x280] sm:$0xff]  ;;  %v1521_v57 = vpack.c.bf16 %v284_v50, %v282_v49  ;;  %v888_v18 = vld [vmem:[#allocation6 + $0x2e8] sm:$0xff]  ;;  %v890_v19 = vld [vmem:[#allocation6 + $0x2f8] sm:$0xff] }
  0x72   : > { %1468 = vmatpush1.bf16.msra.mxu0 %v1467_v60  ;;  %v266_v60 = vld [vmem:[#allocation3 + $0x48] sm:$0xff]  ;;  %v295_v29 = vld [vmem:[#allocation3 + $0x130] sm:$0xff] }
  0x73   : > { %1470 = vmatprep.subr.bf16.mxu0 %v1469_v61  ;;  %v268_v61 = vld [vmem:[#allocation3 + $0x58] sm:$0xff] }
  0x74   : > { %v1505_v0 = vpack.c.bf16 %v268_v61, %v266_v60  ;;  %v882_v60 = vld [vmem:[#allocation6 + $0x2b8] sm:$0xff]  ;;  %v286_v61 = vld [vmem:[#allocation3 + $0xe8] sm:$0xff] }
  0x76   : > { %1472 = vmatpush1.bf16.msra.mxu0 %v1471_v2  ;;  %v267_v2 = vld [vmem:[#allocation3 + $0x50] sm:$0xff] }
  0x77   : > { %1474 = vmatprep.subr.bf16.mxu0 %v1473_v3  ;;  %v254_v3 = vld [vmem:[%s2190_s26 + $0x8] sm:$0xff]  ;;  %v1507_v10 = vpack.c.bf16 %v267_v2, %v265_v1  ;;  %v285_v1 = vld [vmem:[#allocation3 + $0xe0] sm:$0xff] }
  0x7a   : > { %1476 = vmatpush1.bf16.msra.mxu0 %v1475_v8  ;;  %v860_v8 = vld [vmem:[#allocation6 + $0x208] sm:$0xff] }
  0x7b   : > { %1478 = vmatprep.subr.bf16.mxu0 %v1477_v9  ;;  %v859_v9 = vld [vmem:[#allocation6 + $0x200] sm:$0xff]  ;;  %v1625_v11 = vpack.c.bf16 %v862_v46, %v860_v8  ;;  %v886_v8 = vld [vmem:[#allocation6 + $0x2d8] sm:$0xff]  ;;  %v290_v46 = vld [vmem:[#allocation3 + $0x108] sm:$0xff] }
  0x7c   : > { %v1627_v16 = vpack.c.bf16 %v861_v12, %v859_v9  ;;  %v292_v9 = vld [vmem:[#allocation3 + $0x118] sm:$0xff]  ;;  %v289_v12 = vld [vmem:[#allocation3 + $0x100] sm:$0xff] }
  0x7d   : > { %1626 = vmatprep.subr.bf16.mxu1 %v1625_v11  ;;  %v1527_v11 = vpack.c.bf16 %v287_v6, %v285_v1  ;;  %v312_v1 = vld [vmem:[#allocation3 + $0x1b8] sm:$0xff]  ;;  %v314_v6 = vld [vmem:[#allocation3 + $0x1c8] sm:$0xff] }
  0x7e   : > { %1480 = vmatpush1.bf16.msra.mxu0 %v1479_v14  ;;  %v866_v14 = vld [vmem:[#allocation6 + $0x238] sm:$0xff]  ;;  %1628 = vmatpush1.bf16.msra.mxu1 %v1627_v16  ;;  %v1529_v16 = vpack.c.bf16 %v292_v9, %v290_v46  ;;  %v313_v9 = vld [vmem:[#allocation3 + $0x1c0] sm:$0xff] }
  0x7f   : > { %1482 = vmatprep.subr.bf16.mxu0 %v1481_v15  ;;  %v1509_v15 = vpack.c.bf16 %v272_v5, %v270_v4  ;;  %v1629_v17 = vpack.c.bf16 %v866_v14, %v864_v13  ;;  %v881_v4 = vld [vmem:[#allocation6 + $0x2b0] sm:$0xff]  ;;  %v1649_v13 = vpack.c.bf16 %v886_v8, %v884_v7  ;;  %v883_v14 = vld [vmem:[#allocation6 + $0x2c0] sm:$0xff]  ;;  %v316_v7 = vld [vmem:[#allocation3 + $0x1d8] sm:$0xff] }
  0x80   : > { %v1553_v46 = vpack.c.bf16 %v316_v7, %v314_v6  ;;  %v598_v7 = vld [vmem:[#allocation3 + $0x4e0] sm:$0xff] }
  0x81   : > { %1630 = vmatprep.subr.bf16.mxu1 %v1629_v17  ;;  %v291_v17 = vld [vmem:[#allocation3 + $0x110] sm:$0xff] }
  0x82   : > { %1484 = vmatpush1.bf16.msra.mxu0 %v1483_v20  ;;  %v868_v20 = vld [vmem:[#allocation6 + $0x248] sm:$0xff]  ;;  %1632 = vmatpush1.bf16.msra.mxu1 %v1631_v24  ;;  %v293_v24 = vld [vmem:[#allocation3 + $0x120] sm:$0xff] }
  0x83   : > { %1486 = vmatprep.subr.bf16.mxu0 %v1485_v21  ;;  %v274_v21 = vld [vmem:[#allocation3 + $0x88] sm:$0xff] }
  0x84   : > { %v1513_v30 = vpack.c.bf16 %v276_v22, %v274_v21  ;;  %v296_v21 = vld [vmem:[#allocation3 + $0x138] sm:$0xff] }
  0x86   : > { %1488 = vmatpush1.bf16.msra.mxu0 %v1487_v26  ;;  %v273_v26 = vld [vmem:[#allocation3 + $0x80] sm:$0xff] }
  0x87   : > { %1490 = vmatprep.subr.bf16.mxu0 %v1489_v27  ;;  %v1633_v27 = vpack.c.bf16 %v870_v23, %v868_v20  ;;  %v1515_v38 = vpack.c.bf16 %v275_v31, %v273_v26  ;;  %v294_v20 = vld [vmem:[#allocation3 + $0x128] sm:$0xff]  ;;  %v1531_v23 = vpack.c.bf16 %v291_v17, %v289_v12  ;;  %v887_v26 = vld [vmem:[#allocation6 + $0x2e0] sm:$0xff]  ;;  %v894_v31 = vld [vmem:[#allocation6 + $0x318] sm:$0xff] }
  0x88   : > { %v1533_v28 = vpack.c.bf16 %v296_v21, %v294_v20  ;;  %v320_v12 = vld [vmem:[#allocation3 + $0x1f8] sm:$0xff]  ;;  %v571_v17 = vld [vmem:[#allocation3 + $0x408] sm:$0xff]  ;;  %v570_v21 = vld [vmem:[#allocation3 + $0x400] sm:$0xff] }
  0x89   : > { %1634 = vmatprep.subr.bf16.mxu1 %v1633_v27  ;;  %v889_v27 = vld [vmem:[#allocation6 + $0x2f0] sm:$0xff] }
  0x8a   : > { %1492 = vmatpush1.bf16.msra.mxu0 %v1491_v32  ;;  %v872_v32 = vld [vmem:[#allocation6 + $0x268] sm:$0xff]  ;;  %1636 = vmatpush1.bf16.msra.mxu1 %v1635_v37  ;;  %v297_v37 = vld [vmem:[#allocation3 + $0x140] sm:$0xff] }
  0x8b   : > { %1494 = vmatprep.subr.bf16.mxu0 %v1493_v34  ;;  %v278_v34 = vld [vmem:[#allocation3 + $0xa8] sm:$0xff]  ;;  %v1637_v40 = vpack.c.bf16 %v874_v33, %v872_v32  ;;  %v300_v33 = vld [vmem:[#allocation3 + $0x158] sm:$0xff] }
  0x8c   : > { %v1517_v44 = vpack.c.bf16 %v280_v35, %v278_v34  ;;  %v298_v32 = vld [vmem:[#allocation3 + $0x148] sm:$0xff]  ;;  %v1655_v34 = vpack.c.bf16 %v889_v27, %v887_v26  ;;  %v1535_v35 = vpack.c.bf16 %v295_v29, %v293_v24  ;;  %v577_v24 = vld [vmem:[#allocation3 + $0x438] sm:$0xff]  ;;  %v253_v26 = vld [vmem:[%s2190_s26] sm:$0xff] }
  0x8d   : > { %1638 = vmatprep.subr.bf16.mxu1 %v1637_v40  ;;  %v893_v40 = vld [vmem:[#allocation6 + $0x310] sm:$0xff]  ;;  %v574_v29 = vld [vmem:[#allocation3 + $0x420] sm:$0xff] }
  0x8e   : > { %1496 = vmatpush1.bf16.msra.mxu0 %v1495_v42  ;;  %v871_v42 = vld [vmem:[#allocation6 + $0x260] sm:$0xff] }
  0x8f   : > { %1498 = vmatprep.subr.bf16.mxu0 %v1497_v45  ;;  %v279_v45 = vld [vmem:[#allocation3 + $0xb0] sm:$0xff]  ;;  %v1639_v51 = vpack.c.bf16 %v873_v43, %v871_v42  ;;  %v1537_v42 = vpack.c.bf16 %v300_v33, %v298_v32  ;;  %v643_v32 = vrot.slane %v2193_v41, 2  ;;  %v579_v33 = vld [vmem:[#allocation3 + $0x448] sm:$0xff] }
  0x90   : > { %v1519_v52 = vpack.c.bf16 %v279_v45, %v277_v39  ;;  %v891_v39 = vld [vmem:[#allocation6 + $0x300] sm:$0xff]  ;;  %v299_v43 = vld [vmem:[#allocation3 + $0x150] sm:$0xff]  ;;  %v898_v45 = vld [vmem:[#allocation6 + $0x338] sm:$0xff] }
  0x91   : > { %476 = vmatmul.mubr.f32.vlgmr.msra.gmra.mrb[0].mxu0 %v399_v53  ;;  %v281_v53 = vld [vmem:[#allocation3 + $0xc0] sm:$0xff]  ;;  %1640 = vmatpush1.bf16.msra.mxu1 %v1639_v51  ;;  %v1659_v49 = vpack.c.bf16 %v893_v40, %v891_v39  ;;  %v1539_v50 = vpack.c.bf16 %v299_v43, %v297_v37  ;;  %v580_v39 = vld [vmem:[#allocation3 + $0x450] sm:$0xff]  ;;  %v585_v43 = vld [vmem:[#allocation3 + $0x478] sm:$0xff] }
  0x92   : > { %1500 = vmatpush1.bf16.msra.mxu0 %v1499_v54  ;;  %481 = vmatprep.mubr.f32.mxu0 %v406_v59  ;;  %v1641_v54 = vpack.c.bf16 %v878_v48, %v876_v47  ;;  %v880_v59 = vld [vmem:[#allocation6 + $0x2a8] sm:$0xff]  ;;  %v304_v48 = vld [vmem:[#allocation3 + $0x178] sm:$0xff] }
  0x93   : > { %1502 = vmatprep.subr.bf16.mxu0 %v1501_v56  ;;  %v877_v56 = vld [vmem:[#allocation6 + $0x290] sm:$0xff]  ;;  %v1645_v2 = vpack.c.bf16 %v882_v60, %v880_v59  ;;  %v302_v47 = vld [vmem:[#allocation3 + $0x168] sm:$0xff] }
  0x94   : > { %1642 = vmatprep.subr.bf16.mxu1 %v1641_v54  ;;  %v1541_v54 = vpack.c.bf16 %v304_v48, %v302_v47  ;;  %v582_v47 = vld [vmem:[#allocation3 + $0x460] sm:$0xff]  ;;  %v584_v48 = vld [vmem:[#allocation3 + $0x470] sm:$0xff] }
  0x95   : > { %482 = vmatmul.mubr.f32.gmra.mrb[2].mxu0 %v404_v63  ;;  %v1643_v63 = vpack.c.bf16 %v877_v56, %v875_v55  ;;  %v301_v55 = vld [vmem:[#allocation3 + $0x160] sm:$0xff]  ;;  %v303_v56 = vld [vmem:[#allocation3 + $0x170] sm:$0xff] }
  0x96   : > { %1504 = vmatpush1.bf16.msra.mxu0 %v1503_v62  ;;  %552 = vmatprep.mubr.f32.mxu0 %v254_v3  ;;  %v288_v62 = vld [vmem:[#allocation3 + $0xf8] sm:$0xff]  ;;  %v879_v3 = vld [vmem:[#allocation6 + $0x2a0] sm:$0xff]  ;;  %v1543_v60 = vpack.c.bf16 %v303_v56, %v301_v55  ;;  %v591_v55 = vld [vmem:[#allocation3 + $0x4a8] sm:$0xff] }
  0x97   : > { %1506 = vmatprep.subr.bf16.mxu0 %v1505_v0  ;;  %v1523_v0 = vpack.c.bf16 %v283_v58, %v281_v53  ;;  %v1525_v5 = vpack.c.bf16 %v288_v62, %v286_v61  ;;  %1644 = vmatpush1.bf16.msra.mxu1 %v1643_v63  ;;  %v897_v53 = vld [vmem:[#allocation6 + $0x330] sm:$0xff]  ;;  %v308_v58 = vld [vmem:[#allocation3 + $0x198] sm:$0xff]  ;;  %v305_v62 = vld [vmem:[#allocation3 + $0x180] sm:$0xff] }
  0x98   : > { %1646 = vmatprep.subr.bf16.mxu1 %v1645_v2  ;;  %v307_v63 = vld [vmem:[#allocation3 + $0x190] sm:$0xff]  ;;  %v593_v56 = vld [vmem:[#allocation3 + $0x4b8] sm:$0xff] }
  0x99   : > { %v1547_v2 = vpack.c.bf16 %v307_v63, %v305_v62  ;;  %v597_v62 = vld [vmem:[#allocation3 + $0x4d8] sm:$0xff] }
  0x9a   : > { %1508 = vmatpush1.bf16.msra.mxu0 %v1507_v10  ;;  %v1647_v10 = vpack.c.bf16 %v881_v4, %v879_v3  ;;  %v309_v4 = vld [vmem:[#allocation3 + $0x1a0] sm:$0xff] }
  0x9b   : > { %1510 = vmatprep.subr.bf16.mxu0 %v1509_v15  ;;  %v885_v15 = vld [vmem:[#allocation6 + $0x2d0] sm:$0xff] }
  0x9c   : > { %1648 = vmatpush1.bf16.msra.mxu1 %v1647_v10  ;;  %v1651_v22 = vpack.c.bf16 %v885_v15, %v883_v14  ;;  %v315_v10 = vld [vmem:[#allocation3 + $0x1d0] sm:$0xff]  ;;  %v317_v15 = vld [vmem:[#allocation3 + $0x1e0] sm:$0xff] }
  0x9d   : > { %1650 = vmatprep.subr.bf16.mxu1 %v1649_v13  ;;  %v1555_v13 = vpack.c.bf16 %v315_v10, %v313_v9  ;;  %v605_v9 = vld [vmem:[#allocation3 + $0x518] sm:$0xff] }
  0x9e   : > { %1512 = vmatpush1.bf16.msra.mxu0 %v1511_v25  ;;  %v1653_v25 = vpack.c.bf16 %v890_v19, %v888_v18  ;;  %v573_v18 = vld [vmem:[#allocation3 + $0x418] sm:$0xff] }
  0x9f   : > { %1514 = vmatprep.subr.bf16.mxu0 %v1513_v30  ;;  %v892_v30 = vld [vmem:[#allocation6 + $0x308] sm:$0xff]  ;;  %v1561_v20 = vpack.c.bf16 %v573_v18, %v571_v17  ;;  %v606_v18 = vld [vmem:[#allocation3 + $0x520] sm:$0xff] }
  0xa0   : > { %1652 = vmatpush1.bf16.msra.mxu1 %v1651_v22  ;;  %v572_v22 = vld [vmem:[#allocation3 + $0x410] sm:$0xff] }
  0xa1   : > { %1654 = vmatprep.subr.bf16.mxu1 %v1653_v25  ;;  %v566_v25 = vld [vmem:[%s2190_s26 + $0x8] sm:$0xfc]  ;;  %v1563_v27 = vpack.c.bf16 %v572_v22, %v570_v21 }
  0xa2   : > { %1516 = vmatpush1.bf16.msra.mxu0 %v1515_v38  ;;  %v1657_v38 = vpack.c.bf16 %v894_v31, %v892_v30  ;;  %v576_v30 = vld [vmem:[#allocation3 + $0x430] sm:$0xff]  ;;  %v642_v31 = vrot.slane %v566_v25, 2  ;;  %v613_v21 = vld [vmem:[#allocation3 + $0x558] sm:$0xff] }
  0xa3   : > { %1518 = vmatprep.subr.bf16.mxu0 %v1517_v44  ;;  %v896_v44 = vld [vmem:[#allocation6 + $0x328] sm:$0xff]  ;;  %v612_v25 = vld [vmem:[#allocation3 + $0x550] sm:$0xff] }
  0xa4   : > { %1656 = vmatpush1.bf16.msra.mxu1 %v1655_v34  ;;  %v1661_v51 = vpack.c.bf16 %v898_v45, %v896_v44  ;;  %v581_v34 = vld [vmem:[#allocation3 + $0x458] sm:$0xff]  ;;  %v644_v40 = vsel %vm638_vm1, %v642_v31, %v643_v32  ;;  %v616_v31 = vld [vmem:[#allocation3 + $0x570] sm:$0xff] }
  0xa5   : > { %1658 = vmatprep.subr.bf16.mxu1 %v1657_v38  ;;  %v1569_v37 = vpack.c.bf16 %v581_v34, %v579_v33  ;;  %v578_v38 = vld [vmem:[#allocation3 + $0x440] sm:$0xff]  ;;  %v619_v33 = vld [vmem:[#allocation3 + $0x588] sm:$0xff]  ;;  %v621_v34 = vld [vmem:[#allocation3 + $0x598] sm:$0xff] }
  0xa6   : > { %1520 = vmatpush1.bf16.msra.mxu0 %v1519_v52  ;;  %v895_v52 = vld [vmem:[#allocation6 + $0x320] sm:$0xff]  ;;  %v1571_v44 = vpack.c.bf16 %v580_v39, %v578_v38  ;;  %v620_v39 = vld [vmem:[#allocation3 + $0x590] sm:$0xff] }
  0xa7   : > { %1522 = vmatprep.subr.bf16.mxu0 %v1521_v57  ;;  %v306_v57 = vld [vmem:[#allocation3 + $0x188] sm:$0xff]  ;;  %v1663_v59 = vpack.c.bf16 %v897_v53, %v895_v52  ;;  %v586_v53 = vld [vmem:[#allocation3 + $0x480] sm:$0xff] }
  0xa8   : > { %1660 = vmatpush1.bf16.msra.mxu1 %v1659_v49  ;;  %v1545_v61 = vpack.c.bf16 %v308_v58, %v306_v57  ;;  %v587_v49 = vld [vmem:[#allocation3 + $0x488] sm:$0xff]  ;;  %v1581_v58 = vpack.c.bf16 %v593_v56, %v591_v55  ;;  %v618_v38 = vld [vmem:[#allocation3 + $0x580] sm:$0xff]  ;;  %v633_v55 = vld [vmem:[#allocation3 + $0x5f8] sm:$0xff] }
  0xa9   : > { %1662 = vmatprep.subr.bf16.mxu1 %v1661_v51  ;;  %v1575_v51 = vpack.c.bf16 %v584_v48, %v582_v47  ;;  %v624_v47 = vld [vmem:[#allocation3 + $0x5b0] sm:$0xff]  ;;  %v627_v48 = vld [vmem:[#allocation3 + $0x5c8] sm:$0xff] }
  0xaa   : > { %1524 = vmatpush1.bf16.msra.mxu0 %v1523_v0  ;;  %v310_v0 = vld [vmem:[#allocation3 + $0x1a8] sm:$0xff] }
  0xab   : > { %1526 = vmatprep.subr.bf16.mxu0 %v1525_v5  ;;  %v1549_v3 = vpack.c.bf16 %v312_v1, %v310_v0  ;;  %v311_v5 = vld [vmem:[#allocation3 + $0x1b0] sm:$0xff]  ;;  %v594_v1 = vld [vmem:[#allocation3 + $0x4c0] sm:$0xff] }
  0xac   : > { %1664 = vmatpush1.bf16.msra.mxu1 %v1663_v59  ;;  %v1551_v8 = vpack.c.bf16 %v311_v5, %v309_v4  ;;  %v590_v59 = vld [vmem:[#allocation3 + $0x4a0] sm:$0xff]  ;;  %v601_v4 = vld [vmem:[#allocation3 + $0x4f8] sm:$0xff] }
  0xae   : > { %1528 = vmatpush1.bf16.msra.mxu0 %v1527_v11  ;;  %v318_v11 = vld [vmem:[#allocation3 + $0x1e8] sm:$0xff] }
  0xaf   : > { %1530 = vmatprep.subr.bf16.mxu0 %v1529_v16  ;;  %v1557_v14 = vpack.c.bf16 %v320_v12, %v318_v11  ;;  %v319_v16 = vld [vmem:[#allocation3 + $0x1f0] sm:$0xff]  ;;  %v602_v12 = vld [vmem:[#allocation3 + $0x500] sm:$0xff] }
  0xb0   : > { %v1559_v19 = vpack.c.bf16 %v319_v16, %v317_v15  ;;  %v609_v15 = vld [vmem:[#allocation3 + $0x538] sm:$0xff] }
  0xb2   : > { %1532 = vmatpush1.bf16.msra.mxu0 %v1531_v23  ;;  %v575_v23 = vld [vmem:[#allocation3 + $0x428] sm:$0xff] }
  0xb3   : > { %1534 = vmatprep.subr.bf16.mxu0 %v1533_v28  ;;  %v1565_v28 = vpack.c.bf16 %v577_v24, %v575_v23  ;;  %v610_v24 = vld [vmem:[#allocation3 + $0x540] sm:$0xff] }
  0xb6   : > { %1536 = vmatpush1.bf16.msra.mxu0 %v1535_v35  ;;  %v1567_v35 = vpack.c.bf16 %v576_v30, %v574_v29  ;;  %v614_v30 = vld [vmem:[#allocation3 + $0x560] sm:$0xff] }
  0xb7   : > { %1538 = vmatprep.subr.bf16.mxu0 %v1537_v42  ;;  %v583_v42 = vld [vmem:[#allocation3 + $0x468] sm:$0xff] }
  0xb8   : > { %v1573_v45 = vpack.c.bf16 %v585_v43, %v583_v42  ;;  %v625_v42 = vld [vmem:[#allocation3 + $0x5b8] sm:$0xff]  ;;  %v1611_v43 = vpack.c.bf16 %v620_v39, %v618_v38 }
  0xb9   : > { %v922_v38 = vld [vmem:[#allocation6 + $0x3f8] sm:$0xff] }
  0xba   : > { %1540 = vmatpush1.bf16.msra.mxu0 %v1539_v50  ;;  %v589_v50 = vld [vmem:[#allocation3 + $0x498] sm:$0xff] }
  0xbb   : > { %1542 = vmatprep.subr.bf16.mxu0 %v1541_v54  ;;  %v1577_v52 = vpack.c.bf16 %v589_v50, %v587_v49  ;;  %v588_v54 = vld [vmem:[#allocation3 + $0x490] sm:$0xff]  ;;  %v629_v49 = vld [vmem:[#allocation3 + $0x5d8] sm:$0xff] }
  0xbc   : > { %v1579_v57 = vpack.c.bf16 %v588_v54, %v586_v53  ;;  %v628_v53 = vld [vmem:[#allocation3 + $0x5d0] sm:$0xff]  ;;  %v631_v54 = vld [vmem:[#allocation3 + $0x5e8] sm:$0xff] }
  0xbe   : > { %1544 = vmatpush1.bf16.msra.mxu0 %v1543_v60  ;;  %v592_v60 = vld [vmem:[#allocation3 + $0x4b0] sm:$0xff] }
  0xbf   : > { %1546 = vmatprep.subr.bf16.mxu0 %v1545_v61  ;;  %v595_v61 = vld [vmem:[#allocation3 + $0x4c8] sm:$0xff]  ;;  %v1583_v63 = vpack.c.bf16 %v592_v60, %v590_v59  ;;  %v632_v59 = vld [vmem:[#allocation3 + $0x5f0] sm:$0xff] }
  0xc0   : > { %v1585_v0 = vpack.c.bf16 %v597_v62, %v595_v61  ;;  %v565_v60 = vld [vmem:[%s2190_s26] sm:$0xfc]  ;;  %v568_v61 = vld [vmem:[%s2190_s26 + $0x28] sm:$0x3] }
  0xc2   : > { %1548 = vmatpush1.bf16.msra.mxu0 %v1547_v2  ;;  %v596_v2 = vld [vmem:[#allocation3 + $0x4d0] sm:$0xff] }
  0xc3   : > { %1550 = vmatprep.subr.bf16.mxu0 %v1549_v3  ;;  %v599_v3 = vld [vmem:[#allocation3 + $0x4e8] sm:$0xff]  ;;  %v1587_v5 = vpack.c.bf16 %v596_v2, %v594_v1  ;;  %v647_v1 = vrot.slane %v568_v61, 2  ;;  %v567_v2 = vld [vmem:[%s2190_s26 + $0x20] sm:$0x3] }
  0xc4   : > { %v1589_v6 = vpack.c.bf16 %v601_v4, %v599_v3  ;;  %v645_v4 = vrot.slane %v567_v2, 2 }
  0xc6   : > { %1552 = vmatpush1.bf16.msra.mxu0 %v1551_v8  ;;  %v600_v8 = vld [vmem:[#allocation3 + $0x4f0] sm:$0xff] }
  0xc7   : > { %1554 = vmatprep.subr.bf16.mxu0 %v1553_v46  ;;  %v603_v46 = vld [vmem:[#allocation3 + $0x508] sm:$0xff]  ;;  %v1591_v10 = vpack.c.bf16 %v600_v8, %v598_v7  ;;  %v902_v8 = vld [vmem:[#allocation6 + $0x358] sm:$0xff] }
  0xc8   : > { %v1593_v11 = vpack.c.bf16 %v605_v9, %v603_v46  ;;  %v900_v7 = vld [vmem:[#allocation6 + $0x348] sm:$0xff]  ;;  %v901_v9 = vld [vmem:[#allocation6 + $0x350] sm:$0xff] }
  0xc9   : > { %v1665_v46 = vpack.c.bf16 %v902_v8, %v900_v7 }
  0xca   : > { %1556 = vmatpush1.bf16.msra.mxu0 %v1555_v13  ;;  %v604_v13 = vld [vmem:[#allocation3 + $0x510] sm:$0xff] }
  0xcb   : > { %1558 = vmatprep.subr.bf16.mxu0 %v1557_v14  ;;  %v607_v14 = vld [vmem:[#allocation3 + $0x528] sm:$0xff]  ;;  %v1595_v16 = vpack.c.bf16 %v604_v13, %v602_v12  ;;  %1666 = vmatprep.subr.bf16.mxu1 %v1665_v46  ;;  %v906_v12 = vld [vmem:[#allocation6 + $0x378] sm:$0xff]  ;;  %v790_v46 = vld [vmem:[#allocation6] sm:$0xff] }
  0xcc   : > { %v1597_v17 = vpack.c.bf16 %v609_v15, %v607_v14  ;;  %v903_v14 = vld [vmem:[#allocation6 + $0x360] sm:$0xff] }
  0xce   : > { %1560 = vmatpush1.bf16.msra.mxu0 %v1559_v19  ;;  %v608_v19 = vld [vmem:[#allocation3 + $0x530] sm:$0xff] }
  0xcf   : > { %1562 = vmatprep.subr.bf16.mxu0 %v1561_v20  ;;  %v611_v20 = vld [vmem:[#allocation3 + $0x548] sm:$0xff]  ;;  %v1599_v22 = vpack.c.bf16 %v608_v19, %v606_v18  ;;  %v907_v19 = vld [vmem:[#allocation6 + $0x380] sm:$0xff] }
  0xd0   : > { %v1601_v23 = vpack.c.bf16 %v613_v21, %v611_v20  ;;  %v909_v20 = vld [vmem:[#allocation6 + $0x390] sm:$0xff] }
  0xd1   : > { %553 = vmatmul.mubr.f32.vlgmr.msra.gmra.mrb[0].mxu0 %v253_v26  ;;  %v615_v26 = vld [vmem:[#allocation3 + $0x568] sm:$0xff]  ;;  %v1675_v21 = vpack.c.bf16 %v909_v20, %v907_v19  ;;  %v796_v19 = vld [vmem:[#allocation6 + $0x30] sm:$0xff] }
  0xd2   : > { %1564 = vmatpush1.bf16.msra.mxu0 %v1563_v27  ;;  %558 = vmatprep.mubr.f32.mxu0 %v2193_v41  ;;  %v617_v27 = vld [vmem:[#allocation3 + $0x578] sm:$0xff]  ;;  %v905_v41 = vld [vmem:[#allocation6 + $0x370] sm:$0xff] }
  0xd3   : > { %1566 = vmatprep.subr.bf16.mxu0 %v1565_v28  ;;  %v1603_v28 = vpack.c.bf16 %v612_v25, %v610_v24  ;;  %v1605_v29 = vpack.c.bf16 %v617_v27, %v615_v26  ;;  %v1671_v15 = vpack.c.bf16 %v905_v41, %v903_v14  ;;  %v914_v24 = vld [vmem:[#allocation6 + $0x3b8] sm:$0xff]  ;;  %v911_v26 = vld [vmem:[#allocation6 + $0x3a0] sm:$0xff]  ;;  %v913_v27 = vld [vmem:[#allocation6 + $0x3b0] sm:$0xff] }
  0xd5   : > { %559 = vmatmul.mubr.f32.gmra.mrb[2].mxu0 %v2201_v36 }
  0xd6   : > { %1568 = vmatpush1.bf16.msra.mxu0 %v1567_v35  ;;  %717 = vmatprep.mubr.f32.mxu0 %v644_v40  ;;  %v1607_v35 = vpack.c.bf16 %v616_v31, %v614_v30  ;;  %v623_v40 = vld [vmem:[#allocation3 + $0x5a8] sm:$0xff]  ;;  %v918_v30 = vld [vmem:[#allocation6 + $0x3d8] sm:$0xff] }
  0xd7   : > { %1570 = vmatprep.subr.bf16.mxu0 %v1569_v37  ;;  %v1609_v37 = vpack.c.bf16 %v621_v34, %v619_v33  ;;  %v915_v33 = vld [vmem:[#allocation6 + $0x3c0] sm:$0xff]  ;;  %v917_v34 = vld [vmem:[#allocation6 + $0x3d0] sm:$0xff] }
  0xda   : > { %1572 = vmatpush1.bf16.msra.mxu0 %v1571_v44  ;;  %v1613_v44 = vpack.c.bf16 %v625_v42, %v623_v40  ;;  %v919_v40 = vld [vmem:[#allocation6 + $0x3e0] sm:$0xff]  ;;  %v921_v42 = vld [vmem:[#allocation6 + $0x3f0] sm:$0xff] }
  0xdb   : > { %1574 = vmatprep.subr.bf16.mxu0 %v1573_v45  ;;  %v622_v45 = vld [vmem:[#allocation3 + $0x5a0] sm:$0xff] }
  0xdc   : > { %v1615_v50 = vpack.c.bf16 %v624_v47, %v622_v45  ;;  %v793_v45 = vld [vmem:[#allocation6 + $0x18] sm:$0xff] }
  0xde   : > { %1576 = vmatpush1.bf16.msra.mxu0 %v1575_v51  ;;  %v1617_v51 = vpack.c.bf16 %v629_v49, %v627_v48 }
  0xdf   : > { %1578 = vmatprep.subr.bf16.mxu0 %v1577_v52  ;;  %v626_v52 = vld [vmem:[#allocation3 + $0x5c0] sm:$0xff] }
  0xe0   : > { %v1619_v56 = vpack.c.bf16 %v628_v53, %v626_v52 }
  0xe2   : > { %1580 = vmatpush1.bf16.msra.mxu0 %v1579_v57  ;;  %v1621_v57 = vpack.c.bf16 %v633_v55, %v631_v54 }
  0xe3   : > { %1582 = vmatprep.subr.bf16.mxu0 %v1581_v58  ;;  %v630_v58 = vld [vmem:[#allocation3 + $0x5e0] sm:$0xff] }
  0xe4   : > { %v1623_v62 = vpack.c.bf16 %v632_v59, %v630_v58 }
  0xe6   : > { %1584 = vmatpush1.bf16.msra.mxu0 %v1583_v63  ;;  %v639_v63 = vrot.slane %v565_v60, 2 }
  0xe7   : > { %1586 = vmatprep.subr.bf16.mxu0 %v1585_v0  ;;  %v640_v0 = vrot.slane %v2201_v36, 2  ;;  %v899_v36 = vld [vmem:[#allocation6 + $0x340] sm:$0xff] }
  0xe9   : > { %v641_v3 = vsel %vm638_vm1, %v639_v63, %v640_v0 }
  0xea   : > { %1588 = vmatpush1.bf16.msra.mxu0 %v1587_v5  ;;  %v648_v5 = vsel %vm638_vm1, %v643_v32, %v647_v1  ;;  %v908_v32 = vld [vmem:[#allocation6 + $0x388] sm:$0xff] }
  0xeb   : > { %1590 = vmatprep.subr.bf16.mxu0 %v1589_v6  ;;  %v646_v6 = vsel %vm638_vm1, %v640_v0, %v645_v4 }
  0xee   : > { %1592 = vmatpush1.bf16.msra.mxu0 %v1591_v10  ;;  %v1667_v10 = vpack.c.bf16 %v901_v9, %v899_v36  ;;  %v792_v36 = vld [vmem:[#allocation6 + $0x10] sm:$0xff] }
  0xef   : > { %1594 = vmatprep.subr.bf16.mxu0 %v1593_v11  ;;  %v904_v11 = vld [vmem:[#allocation6 + $0x368] sm:$0xff] }
  0xf0   : > { %1668 = vmatpush1.bf16.msra.mxu1 %v1667_v10  ;;  %v1669_v13 = vpack.c.bf16 %v906_v12, %v904_v11  ;;  %v795_v11 = vld [vmem:[#allocation6 + $0x28] sm:$0xff]  ;;  %v797_v12 = vld [vmem:[#allocation6 + $0x38] sm:$0xff] }
  0xf2   : > { %1596 = vmatpush1.bf16.msra.mxu0 %v1595_v16  ;;  %1670 = vmatprep.subr.bf16.mxu1 %v1669_v13  ;;  %v910_v16 = vld [vmem:[#allocation6 + $0x398] sm:$0xff] }
  0xf3   : > { %1598 = vmatprep.subr.bf16.mxu0 %v1597_v17  ;;  %v736_v17 = vlaneseq  ;;  %v1673_v18 = vpack.c.bf16 %v910_v16, %v908_v32  ;;  %v1693_v16 = vpack.c.bf16 %v797_v12, %v795_v11  ;;  %v824_v11 = vld [vmem:[#allocation6 + $0x110] sm:$0xff]  ;;  %v827_v12 = vld [vmem:[#allocation6 + $0x128] sm:$0xff] }
  0xf4   : > { %1672 = vmatpush1.bf16.msra.mxu1 %v1671_v15  ;;  %v1691_v15 = vpack.c.bf16 %v792_v36, %v790_v46  ;;  %v825_v46 = vld [vmem:[#allocation6 + $0x118] sm:$0xff] }
  0xf5   : > { %vm756_vm2 = vcmp.lt.s32.totalorder %v736_v17, 256  ;;  %1674 = vmatprep.subr.bf16.mxu1 %v1673_v18  ;;  %v2230_v48 = vshrl.u32 %v736_v17, 7  ;;  %v794_v18 = vld [vmem:[#allocation6 + $0x20] sm:$0xff] }
  0xf6   : > { %1600 = vmatpush1.bf16.msra.mxu0 %v1599_v22  ;;  %v2031_v22 = vmov 0.0  }
  0xf7   : > { %1602 = vmatprep.subr.bf16.mxu0 %v1601_v23  ;;  %758 = vst.msk [vmem:[#allocation2] ss:$8 sm:$0x3] %vm756_vm2, %v2031_v22  ;;  %761 = vst.msk [vmem:[#allocation2 + $0x21] ss:$8 sm:$0x3] %vm756_vm2, %v2031_v22 }
  0xf8   : > { %1676 = vmatpush1.bf16.msra.mxu1 %v1675_v21  ;;  %v912_v23 = vld [vmem:[#allocation6 + $0x3a8] sm:$0xff]  ;;  %v738_v49 = vsub.s32 0, %v2230_v48 }
  0xf9   : > { %v1677_v25 = vpack.c.bf16 %v914_v24, %v912_v23  ;;  %v799_v23 = vld [vmem:[#allocation6 + $0x48] sm:$0xff]  ;;  %v801_v24 = vld [vmem:[#allocation6 + $0x58] sm:$0xff] }
  0xfa   : > { %1604 = vmatpush1.bf16.msra.mxu0 %v1603_v28  ;;  %v1679_v28 = vpack.c.bf16 %v913_v27, %v911_v26  ;;  %v1695_v26 = vpack.c.bf16 %v796_v19, %v794_v18 }
  0xfb   : > { %1606 = vmatprep.subr.bf16.mxu0 %v1605_v29  ;;  %1678 = vmatprep.subr.bf16.mxu1 %v1677_v25  ;;  %v916_v29 = vld [vmem:[#allocation6 + $0x3c8] sm:$0xff] }
  0xfc   : > { %1680 = vmatpush1.bf16.msra.mxu1 %v1679_v28  ;;  %v1681_v31 = vpack.c.bf16 %v918_v30, %v916_v29  ;;  %v1697_v28 = vpack.c.bf16 %v801_v24, %v799_v23  ;;  %v798_v29 = vld [vmem:[#allocation6 + $0x40] sm:$0xff]  ;;  %v800_v30 = vld [vmem:[#allocation6 + $0x50] sm:$0xff]  ;;  %v837_v23 = vld [vmem:[#allocation6 + $0x178] sm:$0xff] }
  0xfe   : > { %1608 = vmatpush1.bf16.msra.mxu0 %v1607_v35  ;;  %v1683_v35 = vpack.c.bf16 %v917_v34, %v915_v33  ;;  %1682 = vmatprep.subr.bf16.mxu1 %v1681_v31  ;;  %v803_v33 = vld [vmem:[#allocation6 + $0x68] sm:$0xff]  ;;  %v805_v34 = vld [vmem:[#allocation6 + $0x78] sm:$0xff] }
  0xff   : > { %1610 = vmatprep.subr.bf16.mxu0 %v1609_v37  ;;  %v920_v37 = vld [vmem:[#allocation6 + $0x3e8] sm:$0xff] }
 0x100   : > { %1684 = vmatpush1.bf16.msra.mxu1 %v1683_v35  ;;  %v1685_v39 = vpack.c.bf16 %v922_v38, %v920_v37  ;;  %v1699_v37 = vpack.c.bf16 %v800_v30, %v798_v29  ;;  %v1701_v38 = vpack.c.bf16 %v805_v34, %v803_v33  ;;  %v841_v29 = vld [vmem:[#allocation6 + $0x198] sm:$0xff]  ;;  %v838_v33 = vld [vmem:[#allocation6 + $0x180] sm:$0xff]  ;;  %v840_v34 = vld [vmem:[#allocation6 + $0x190] sm:$0xff] }
 0x102   : > { %1612 = vmatpush1.bf16.msra.mxu0 %v1611_v43  ;;  %v1687_v43 = vpack.c.bf16 %v921_v42, %v919_v40  ;;  %1686 = vmatprep.subr.bf16.mxu1 %v1685_v39  ;;  %v802_v39 = vld [vmem:[#allocation6 + $0x60] sm:$0xff]  ;;  %v804_v40 = vld [vmem:[#allocation6 + $0x70] sm:$0xff]  ;;  %v807_v42 = vld [vmem:[#allocation6 + $0x88] sm:$0xff] }
 0x103   : > { %1614 = vmatprep.subr.bf16.mxu0 %v1613_v44  ;;  %v791_v44 = vld [vmem:[#allocation6 + $0x8] sm:$0xff] }
 0x104   : > { %1688 = vmatpush1.bf16.msra.mxu1 %v1687_v43  ;;  %v1689_v47 = vpack.c.bf16 %v793_v45, %v791_v44  ;;  %v809_v43 = vld [vmem:[#allocation6 + $0x98] sm:$0xff]  ;;  %v1703_v44 = vpack.c.bf16 %v804_v40, %v802_v39  ;;  %v842_v40 = vld [vmem:[#allocation6 + $0x1a0] sm:$0xff] }
 0x105   : > { %v1705_v45 = vpack.c.bf16 %v809_v43, %v807_v42  ;;  %v844_v42 = vld [vmem:[#allocation6 + $0x1b0] sm:$0xff]  ;;  %v847_v43 = vld [vmem:[#allocation6 + $0x1c8] sm:$0xff] }
 0x106   : > { %1616 = vmatpush1.bf16.msra.mxu0 %v1615_v50  ;;  %1690 = vmatprep.subr.bf16.mxu1 %v1689_v47  ;;  %v734_v50 = vld [vmem:[%s2336_s2] sm:$0x3]  ;;  %v806_v47 = vld [vmem:[#allocation6 + $0x80] sm:$0xff] }
 0x107   : > { %1618 = vmatprep.subr.bf16.mxu0 %v1617_v51  ;;  %v742_v51 = vsub.s32 1, %v2230_v48  ;;  %v739_v52 = vrot.slane %v734_v50, %v738_v49 }
 0x109   : > { %v743_v53 = vrot.slane %v734_v50, %v742_v51  ;;  %v808_v50 = vld [vmem:[#allocation6 + $0x90] sm:$0xff] }
 0x10a   : > { %1620 = vmatpush1.bf16.msra.mxu0 %v1619_v56 }
 0x10b   : > { %1622 = vmatprep.subr.bf16.mxu0 %v1621_v57 }
 0x10e   : > { %1624 = vmatpush1.bf16.msra.mxu0 %v1623_v62 }
 0x111   : > { %718 = vmatmul.mubr.f32.vlgmr.msra.gmra.mrb[0].mxu0 %v641_v3 }
 0x112   : > { %723 = vmatprep.mubr.f32.mxu0 %v648_v5 }
 0x115   : > { %724 = vmatmul.mubr.f32.gmra.mrb[2].mxu0 %v646_v6 }
 0x1e4   : > { %v719_v54 = vpop.f32.mrb[0].mxu0 }
 0x1e5   : > { %v746_v55 = vadd.f32 %v739_v52, %v719_v54  ;;  %v721_v56 = vpop.f32.mrb[1].mxu0  ;;  %v1707_v54 = vpack.c.bf16 %v808_v50, %v806_v47  ;;  %v846_v50 = vld [vmem:[#allocation6 + $0x1c0] sm:$0xff] }
 0x1e6   : > { %v747_v57 = vadd.f32 %v743_v53, %v721_v56  ;;  %v810_v56 = vld [vmem:[#allocation6 + $0xa0] sm:$0xff] }
 0x1e7   : > { %v750_v58 = vmax.f32 %v746_v55, 0.0 }
 0x1e8   : > { %v751_v59 = vmax.f32 %v747_v57, 0.0  ;;  %v725_v60 = vpop.f32.mrb[2].mxu0  ;;  %v812_v57 = vld [vmem:[#allocation6 + $0xb0] sm:$0xff] }
 0x1e9   : > { %v768_v61 = vrot.slane %v750_v58, 7  ;;  %v748_v62 = vadd.f32 %v739_v52, %v725_v60  ;;  %v727_v63 = vpop.f32.mrb[3].mxu0  ;;  %v811_v52 = vld [vmem:[#allocation6 + $0xa8] sm:$0xff]  ;;  %v1711_v60 = vpack.c.bf16 %v812_v57, %v810_v56  ;;  %v850_v57 = vld [vmem:[#allocation6 + $0x1e0] sm:$0xff] }
 0x1ea   : > { %v769_v0 = vrot.slane %v751_v59, 7  ;;  %v749_v1 = vadd.f32 %v743_v53, %v727_v63  ;;  %v813_v53 = vld [vmem:[#allocation6 + $0xb8] sm:$0xff]  ;;  %v815_v58 = vld [vmem:[#allocation6 + $0xc8] sm:$0xff]  ;;  %v816_v63 = vld [vmem:[#allocation6 + $0xd0] sm:$0xff] }
 0x1eb   : > { %780 = vst [vmem:[#allocation2] sm:$0xfe] %v768_v61  ;;  %v752_v2 = vmax.f32 %v748_v62, 0.0  ;;  %v1709_v55 = vpack.c.bf16 %v813_v53, %v811_v52  ;;  %v817_v59 = vld [vmem:[#allocation6 + $0xd8] sm:$0xff]  ;;  %v814_v62 = vld [vmem:[#allocation6 + $0xc0] sm:$0xff]  ;;  %v848_v52 = vld [vmem:[#allocation6 + $0x1d0] sm:$0xff] }
 0x1ec   : > { %781 = vst [vmem:[#allocation2 + $0x8] sm:$0xfe] %v769_v0  ;;  %v753_v3 = vmax.f32 %v749_v1, 0.0  ;;  %v821_v1 = vld [vmem:[#allocation6 + $0xf8] sm:$0xff]  ;;  %v851_v53 = vld [vmem:[#allocation6 + $0x1e8] sm:$0xff] }
 0x1ed   : > { %v770_v4 = vrot.slane %v752_v2, 7  ;;  %v1715_v2 = vpack.c.bf16 %v816_v63, %v814_v62  ;;  %v1102_v63 = vld [vmem:[#allocation6 + $0x400] sm:$0xff] }
 0x1ee   : > { %v772_v5 = vrot.slane %v753_v3, 7 }
 0x1ef   : > { %v2241_v6 = vsel %vm767_vm3, %v768_v61, %v770_v4  ;;  %784 = vst [vmem:[#allocation2 + $0x20] sm:$0x1] %v770_v4  ;;  %v1713_v61 = vpack.c.bf16 %v817_v59, %v815_v58  ;;  %v818_v4 = vld [vmem:[#allocation6 + $0xe0] sm:$0xff]  ;;  %v852_v58 = vld [vmem:[#allocation6 + $0x1f0] sm:$0xff]  ;;  %v1103_v59 = vld [vmem:[#allocation6 + $0x408] sm:$0xff] }
 0x1f0   : > { %v2243_v7 = vsel %vm767_vm3, %v769_v0, %v772_v5  ;;  %785 = vst [vmem:[#allocation2 + $0x28] sm:$0x1] %v772_v5  ;;  %v930_v41 = vrot.slane %v2241_v6, 1  ;;  %v819_v0 = vld [vmem:[#allocation6 + $0xe8] sm:$0xff]  ;;  %v820_v5 = vld [vmem:[#allocation6 + $0xf0] sm:$0xff] }
 0x1f1   : > { %v933_v14 = vrot.slane %v2243_v7, 1  ;;  %v1717_v3 = vpack.c.bf16 %v821_v1, %v819_v0  ;;  %v1719_v36 = vpack.c.bf16 %v820_v5, %v818_v4  ;;  %v1104_v0 = vld [vmem:[#allocation6 + $0x410] sm:$0xff]  ;;  %v1107_v1 = vld [vmem:[#allocation6 + $0x428] sm:$0xff] }
 0x1f2   : > { %v854_v8 = vld [vmem:[#allocation2] sm:$0xfe] }
 0x1f3   : > { %v855_v9 = vld [vmem:[#allocation2 + $0x8] sm:$0xfe]  ;;  %v929_v10 = vrot.slane %v854_v8, 1  ;;  %v823_v8 = vld [vmem:[#allocation6 + $0x108] sm:$0xff] }
 0x1f4   : > { %v932_v13 = vrot.slane %v855_v9, 1  ;;  %v787_v35 = vld [vmem:[#allocation2 + $0x8] sm:$0xff]  ;;  %v1721_v9 = vpack.c.bf16 %v825_v46, %v823_v8  ;;  %v1106_v8 = vld [vmem:[#allocation6 + $0x420] sm:$0xff]  ;;  %v1108_v46 = vld [vmem:[#allocation6 + $0x430] sm:$0xff] }
 0x1f5   : > { %v931_v20 = vsel %vm396_vm0, %v929_v10, %v930_v41  ;;  %v822_v10 = vld [vmem:[#allocation6 + $0x100] sm:$0xff]  ;;  %v1098_v4 = vld [vmem:[#allocation2 + $0x8] sm:$0xfc] }
 0x1f6   : > { %v934_v32 = vsel %vm396_vm0, %v932_v13, %v933_v14  ;;  %v856_v17 = vld [vmem:[#allocation2 + $0x20] sm:$0x1]  ;;  %v829_v13 = vld [vmem:[#allocation6 + $0x138] sm:$0xff] }
 0x1f7   : > { %1007 = vmatprep.mubr.f32.mxu1 %v934_v32  ;;  %v857_v21 = vld [vmem:[#allocation2 + $0x28] sm:$0x1]  ;;  %v935_v22 = vrot.slane %v856_v17, 1  ;;  %v828_v32 = vld [vmem:[#allocation6 + $0x130] sm:$0xff] }
 0x1f8   : > { %1008 = vmatmul.mubr.f32.vlgmr.msra.gmra.mrb[0].mxu1 %v931_v20  ;;  %v937_v25 = vrot.slane %v857_v21, 1  ;;  %v833_v17 = vld [vmem:[#allocation6 + $0x158] sm:$0xff]  ;;  %v830_v20 = vld [vmem:[#allocation6 + $0x140] sm:$0xff]  ;;  %v832_v21 = vld [vmem:[#allocation6 + $0x150] sm:$0xff] }
 0x1f9   : > { %1692 = vmatpush1.bf16.msra.mxu1 %v1691_v15  ;;  %v936_v31 = vsel %vm396_vm0, %v930_v41, %v935_v22  ;;  %v1725_v41 = vpack.c.bf16 %v829_v13, %v827_v12  ;;  %v826_v15 = vld [vmem:[#allocation6 + $0x120] sm:$0xff]  ;;  %v835_v22 = vld [vmem:[#allocation6 + $0x168] sm:$0xff]  ;;  %v1731_v24 = vpack.c.bf16 %v832_v21, %v830_v20  ;;  %v1759_v12 = vpack.c.bf16 %v1108_v46, %v1106_v8  ;;  %v1116_v21 = vld [vmem:[#allocation6 + $0x470] sm:$0xff] }
 0x1fa   : > { %v938_v27 = vsel %vm396_vm0, %v933_v14, %v937_v25  ;;  %1694 = vmatprep.subr.bf16.mxu1 %v1693_v16  ;;  %v1723_v14 = vpack.c.bf16 %v824_v11, %v822_v10  ;;  %v831_v16 = vld [vmem:[#allocation6 + $0x148] sm:$0xff]  ;;  %v1727_v18 = vpack.c.bf16 %v828_v32, %v826_v15  ;;  %v1733_v25 = vpack.c.bf16 %v837_v23, %v835_v22  ;;  %v1113_v10 = vld [vmem:[#allocation6 + $0x458] sm:$0xff]  ;;  %v1112_v15 = vld [vmem:[#allocation6 + $0x450] sm:$0xff] }
 0x1fb   : > { %1013 = vmatprep.mubr.f32.mxu1 %v938_v27  ;;  %v1729_v19 = vpack.c.bf16 %v833_v17, %v831_v16  ;;  %v836_v27 = vld [vmem:[#allocation6 + $0x170] sm:$0xff]  ;;  %v1173_v11 = vrot.slane %v1098_v4, 2  ;;  %v1174_v13 = vrot.slane %v2243_v7, 2  ;;  %v1115_v32 = vld [vmem:[#allocation6 + $0x468] sm:$0xff]  ;;  %v1117_v16 = vld [vmem:[#allocation6 + $0x478] sm:$0xff] }
 0x1fc   : > { %1014 = vmatmul.mubr.f32.gmra.mrb[2].mxu1 %v936_v31  ;;  %v1114_v20 = vld [vmem:[#allocation6 + $0x460] sm:$0xff]  ;;  %v1119_v22 = vld [vmem:[#allocation6 + $0x488] sm:$0xff]  ;;  %v1121_v23 = vld [vmem:[#allocation6 + $0x498] sm:$0xff] }
 0x1fd   : > { %1696 = vmatpush1.bf16.msra.mxu1 %v1695_v26  ;;  %1084 = vmatprep.mubr.f32.mxu1 %v787_v35  ;;  %v834_v26 = vld [vmem:[#allocation6 + $0x160] sm:$0xff]  ;;  %v843_v35 = vld [vmem:[#allocation6 + $0x1a8] sm:$0xff]  ;;  %v1175_v17 = vsel %vm638_vm1, %v1173_v11, %v1174_v13  ;;  %v1144_v8 = vld [vmem:[#allocation6 + $0x550] sm:$0xff] }
 0x1fe   : > { %1698 = vmatprep.subr.bf16.mxu1 %v1697_v28  ;;  %v839_v28 = vld [vmem:[#allocation6 + $0x188] sm:$0xff]  ;;  %v1735_v30 = vpack.c.bf16 %v836_v27, %v834_v26  ;;  %v1118_v26 = vld [vmem:[#allocation6 + $0x480] sm:$0xff]  ;;  %v1120_v27 = vld [vmem:[#allocation6 + $0x490] sm:$0xff] }
 0x1ff   : > { %v1737_v31 = vpack.c.bf16 %v841_v29, %v839_v28  ;;  %v1123_v28 = vld [vmem:[#allocation6 + $0x4a8] sm:$0xff]  ;;  %v1125_v29 = vld [vmem:[#allocation6 + $0x4b8] sm:$0xff]  ;;  %v1146_v11 = vld [vmem:[#allocation6 + $0x560] sm:$0xff] }
 0x200   : > { %v1147_v46 = vld [vmem:[#allocation6 + $0x568] sm:$0xff] }
 0x201   : > { %1700 = vmatpush1.bf16.msra.mxu1 %v1699_v37  ;;  %v845_v37 = vld [vmem:[#allocation6 + $0x1b8] sm:$0xff] }
 0x202   : > { %1702 = vmatprep.subr.bf16.mxu1 %v1701_v38  ;;  %v1739_v38 = vpack.c.bf16 %v840_v34, %v838_v33  ;;  %v1741_v39 = vpack.c.bf16 %v845_v37, %v843_v35  ;;  %v1122_v33 = vld [vmem:[#allocation6 + $0x4a0] sm:$0xff]  ;;  %v1124_v34 = vld [vmem:[#allocation6 + $0x4b0] sm:$0xff]  ;;  %v1127_v35 = vld [vmem:[#allocation6 + $0x4c8] sm:$0xff] }
 0x203   : > { %v1129_v37 = vld [vmem:[#allocation6 + $0x4d8] sm:$0xff] }
 0x205   : > { %1704 = vmatpush1.bf16.msra.mxu1 %v1703_v44  ;;  %v849_v44 = vld [vmem:[#allocation6 + $0x1d8] sm:$0xff] }
 0x206   : > { %1706 = vmatprep.subr.bf16.mxu1 %v1705_v45  ;;  %v1743_v45 = vpack.c.bf16 %v844_v42, %v842_v40  ;;  %v1745_v47 = vpack.c.bf16 %v849_v44, %v847_v43  ;;  %v1126_v40 = vld [vmem:[#allocation6 + $0x4c0] sm:$0xff]  ;;  %v1128_v42 = vld [vmem:[#allocation6 + $0x4d0] sm:$0xff]  ;;  %v1131_v43 = vld [vmem:[#allocation6 + $0x4e8] sm:$0xff] }
 0x207   : > { %v1133_v44 = vld [vmem:[#allocation6 + $0x4f8] sm:$0xff] }
 0x209   : > { %1708 = vmatpush1.bf16.msra.mxu1 %v1707_v54  ;;  %v853_v54 = vld [vmem:[#allocation6 + $0x1f8] sm:$0xff] }
 0x20a   : > { %1710 = vmatprep.subr.bf16.mxu1 %v1709_v55  ;;  %v1747_v55 = vpack.c.bf16 %v848_v52, %v846_v50  ;;  %v1749_v56 = vpack.c.bf16 %v853_v54, %v851_v53  ;;  %v1130_v50 = vld [vmem:[#allocation6 + $0x4e0] sm:$0xff]  ;;  %v1132_v52 = vld [vmem:[#allocation6 + $0x4f0] sm:$0xff]  ;;  %v1135_v53 = vld [vmem:[#allocation6 + $0x508] sm:$0xff] }
 0x20b   : > { %v1137_v54 = vld [vmem:[#allocation6 + $0x518] sm:$0xff] }
 0x20d   : > { %1712 = vmatpush1.bf16.msra.mxu1 %v1711_v60  ;;  %v1105_v60 = vld [vmem:[#allocation6 + $0x418] sm:$0xff] }
 0x20e   : > { %1714 = vmatprep.subr.bf16.mxu1 %v1713_v61  ;;  %v1751_v61 = vpack.c.bf16 %v852_v58, %v850_v57  ;;  %v1753_v62 = vpack.c.bf16 %v1105_v60, %v1103_v59  ;;  %v1134_v57 = vld [vmem:[#allocation6 + $0x500] sm:$0xff]  ;;  %v1136_v58 = vld [vmem:[#allocation6 + $0x510] sm:$0xff]  ;;  %v1139_v59 = vld [vmem:[#allocation6 + $0x528] sm:$0xff] }
 0x20f   : > { %v1141_v60 = vld [vmem:[#allocation6 + $0x538] sm:$0xff] }
 0x211   : > { %1716 = vmatpush1.bf16.msra.mxu1 %v1715_v2  ;;  %v1109_v2 = vld [vmem:[#allocation6 + $0x438] sm:$0xff] }
 0x212   : > { %1718 = vmatprep.subr.bf16.mxu1 %v1717_v3  ;;  %v1755_v3 = vpack.c.bf16 %v1104_v0, %v1102_v63  ;;  %v1757_v5 = vpack.c.bf16 %v1109_v2, %v1107_v1  ;;  %v1138_v63 = vld [vmem:[#allocation6 + $0x520] sm:$0xff]  ;;  %v1140_v0 = vld [vmem:[#allocation6 + $0x530] sm:$0xff]  ;;  %v1143_v1 = vld [vmem:[#allocation6 + $0x548] sm:$0xff] }
 0x213   : > { %v1145_v2 = vld [vmem:[#allocation6 + $0x558] sm:$0xff] }
 0x214   : > { %v1793_v4 = vpack.c.bf16 %v1145_v2, %v1143_v1 }
 0x215   : > { %1720 = vmatpush1.bf16.msra.mxu1 %v1719_v36  ;;  %v786_v36 = vld [vmem:[#allocation2] sm:$0xff] }
 0x216   : > { %1722 = vmatprep.subr.bf16.mxu1 %v1721_v9  ;;  %v1111_v9 = vld [vmem:[#allocation6 + $0x448] sm:$0xff] }
 0x219   : > { %1724 = vmatpush1.bf16.msra.mxu1 %v1723_v14  ;;  %v1761_v14 = vpack.c.bf16 %v1113_v10, %v1111_v9 }
 0x21a   : > { %1726 = vmatprep.subr.bf16.mxu1 %v1725_v41  ;;  %v1110_v41 = vld [vmem:[#allocation6 + $0x440] sm:$0xff] }
 0x21d   : > { %1728 = vmatpush1.bf16.msra.mxu1 %v1727_v18  ;;  %v1763_v18 = vpack.c.bf16 %v1112_v15, %v1110_v41  ;;  %v1153_v41 = vld [vmem:[#allocation6 + $0x598] sm:$0xff] }
 0x21e   : > { %1730 = vmatprep.subr.bf16.mxu1 %v1729_v19  ;;  %v1765_v19 = vpack.c.bf16 %v1117_v16, %v1115_v32  ;;  %v1150_v16 = vld [vmem:[#allocation6 + $0x580] sm:$0xff] }
 0x221   : > { %1732 = vmatpush1.bf16.msra.mxu1 %v1731_v24  ;;  %v1767_v24 = vpack.c.bf16 %v1116_v21, %v1114_v20 }
 0x222   : > { %1734 = vmatprep.subr.bf16.mxu1 %v1733_v25  ;;  %v1769_v25 = vpack.c.bf16 %v1121_v23, %v1119_v22  ;;  %v1154_v22 = vld [vmem:[#allocation6 + $0x5a0] sm:$0xff]  ;;  %v1156_v23 = vld [vmem:[#allocation6 + $0x5b0] sm:$0xff] }
 0x225   : > { %1736 = vmatpush1.bf16.msra.mxu1 %v1735_v30  ;;  %v1771_v30 = vpack.c.bf16 %v1120_v27, %v1118_v26  ;;  %v1807_v26 = vpack.c.bf16 %v1156_v23, %v1154_v22 }
 0x226   : > { %1738 = vmatprep.subr.bf16.mxu1 %v1737_v31  ;;  %v1773_v31 = vpack.c.bf16 %v1125_v29, %v1123_v28  ;;  %v1158_v28 = vld [vmem:[#allocation6 + $0x5c0] sm:$0xff]  ;;  %v1160_v29 = vld [vmem:[#allocation6 + $0x5d0] sm:$0xff] }
 0x229   : > { %1740 = vmatpush1.bf16.msra.mxu1 %v1739_v38  ;;  %v1775_v38 = vpack.c.bf16 %v1124_v34, %v1122_v33  ;;  %v1811_v33 = vpack.c.bf16 %v1160_v29, %v1158_v28 }
 0x22a   : > { %1742 = vmatprep.subr.bf16.mxu1 %v1741_v39  ;;  %v1777_v39 = vpack.c.bf16 %v1129_v37, %v1127_v35  ;;  %v1162_v35 = vld [vmem:[#allocation6 + $0x5e0] sm:$0xff]  ;;  %v1164_v37 = vld [vmem:[#allocation6 + $0x5f0] sm:$0xff] }
 0x22d   : > { %1744 = vmatpush1.bf16.msra.mxu1 %v1743_v45  ;;  %v1779_v45 = vpack.c.bf16 %v1128_v42, %v1126_v40  ;;  %v1100_v40 = vld [vmem:[#allocation2 + $0x28] sm:$0x3] }
 0x22e   : > { %1746 = vmatprep.subr.bf16.mxu1 %v1745_v47  ;;  %v1781_v47 = vpack.c.bf16 %v1133_v44, %v1131_v43  ;;  %v1178_v43 = vrot.slane %v1100_v40, 2  ;;  %v1099_v44 = vld [vmem:[#allocation2 + $0x20] sm:$0x3] }
 0x231   : > { %1748 = vmatpush1.bf16.msra.mxu1 %v1747_v55  ;;  %v1783_v55 = vpack.c.bf16 %v1132_v52, %v1130_v50  ;;  %v1176_v50 = vrot.slane %v1099_v44, 2  ;;  %v1179_v52 = vsel %vm638_vm1, %v1174_v13, %v1178_v43 }
 0x232   : > { %1750 = vmatprep.subr.bf16.mxu1 %v1749_v56  ;;  %v1785_v56 = vpack.c.bf16 %v1137_v54, %v1135_v53  ;;  %v1281_v54 = vld [vmem:[%s2190_s26] sm:$0xfe] }
 0x235   : > { %1752 = vmatpush1.bf16.msra.mxu1 %v1751_v61  ;;  %v1787_v61 = vpack.c.bf16 %v1136_v58, %v1134_v57  ;;  %v1284_v57 = vld [vmem:[%s2190_s26 + $0x18] sm:$0xff]  ;;  %v1293_v58 = vrot.slane %v1281_v54, 1 }
 0x236   : > { %1754 = vmatprep.subr.bf16.mxu1 %v1753_v62  ;;  %v1789_v62 = vpack.c.bf16 %v1141_v60, %v1139_v59  ;;  %v1297_v60 = vrot.slane %v1284_v57, 1 }
 0x238   : > { %1085 = vmatmul.mubr.f32.vlgmr.msra.gmra.mrb[0].mxu1 %v786_v36  ;;  %v1149_v36 = vld [vmem:[#allocation6 + $0x578] sm:$0xff] }
 0x239   : > { %1090 = vmatprep.mubr.f32.mxu1 %v2243_v7  ;;  %1756 = vmatpush1.bf16.msra.mxu1 %v1755_v3  ;;  %v1791_v3 = vpack.c.bf16 %v1140_v0, %v1138_v63  ;;  %v1797_v10 = vpack.c.bf16 %v1149_v36, %v1147_v46  ;;  %v1286_v63 = vld [vmem:[%s2190_s26 + $0x28] sm:$0x1] }
 0x23a   : > { %1758 = vmatprep.subr.bf16.mxu1 %v1757_v5  ;;  %v1142_v5 = vld [vmem:[#allocation6 + $0x540] sm:$0xff] }
 0x23b   : > { %v1795_v9 = vpack.c.bf16 %v1144_v8, %v1142_v5  ;;  %v1301_v8 = vrot.slane %v1286_v63, 1 }
 0x23c   : > { %1091 = vmatmul.mubr.f32.gmra.mrb[2].mxu1 %v2241_v6 }
 0x23d   : > { %1760 = vmatpush1.bf16.msra.mxu1 %v1759_v12  ;;  %1248 = vmatprep.mubr.f32.mxu1 %v1175_v17  ;;  %v1148_v12 = vld [vmem:[#allocation6 + $0x570] sm:$0xff] }
 0x23e   : > { %1762 = vmatprep.subr.bf16.mxu1 %v1761_v14  ;;  %v1151_v14 = vld [vmem:[#allocation6 + $0x588] sm:$0xff]  ;;  %v1799_v15 = vpack.c.bf16 %v1148_v12, %v1146_v11  ;;  %v1152_v17 = vld [vmem:[#allocation6 + $0x590] sm:$0xff]  ;;  %v1302_v12 = vsel %vm396_vm0, %v1297_v60, %v1301_v8 }
 0x23f   : > { %v1801_v32 = vpack.c.bf16 %v1153_v41, %v1151_v14  ;;  %v1803_v20 = vpack.c.bf16 %v1152_v17, %v1150_v16 }
 0x241   : > { %1764 = vmatpush1.bf16.msra.mxu1 %v1763_v18  ;;  %v1155_v18 = vld [vmem:[#allocation6 + $0x5a8] sm:$0xff] }
 0x242   : > { %1766 = vmatprep.subr.bf16.mxu1 %v1765_v19  ;;  %v1157_v19 = vld [vmem:[#allocation6 + $0x5b8] sm:$0xff] }
 0x243   : > { %v1805_v21 = vpack.c.bf16 %v1157_v19, %v1155_v18 }
 0x245   : > { %1768 = vmatpush1.bf16.msra.mxu1 %v1767_v24  ;;  %v1159_v24 = vld [vmem:[#allocation6 + $0x5c8] sm:$0xff] }
 0x246   : > { %1770 = vmatprep.subr.bf16.mxu1 %v1769_v25  ;;  %v1161_v25 = vld [vmem:[#allocation6 + $0x5d8] sm:$0xff] }
 0x247   : > { %v1809_v27 = vpack.c.bf16 %v1161_v25, %v1159_v24 }
 0x249   : > { %1772 = vmatpush1.bf16.msra.mxu1 %v1771_v30  ;;  %v1163_v30 = vld [vmem:[#allocation6 + $0x5e8] sm:$0xff] }
 0x24a   : > { %1774 = vmatprep.subr.bf16.mxu1 %v1773_v31  ;;  %v1165_v31 = vld [vmem:[#allocation6 + $0x5f8] sm:$0xff] }
 0x24b   : > { %v1813_v34 = vpack.c.bf16 %v1165_v31, %v1163_v30 }
 0x24d   : > { %1776 = vmatpush1.bf16.msra.mxu1 %v1775_v38  ;;  %v1097_v38 = vld [vmem:[#allocation2] sm:$0xfc] }
 0x24e   : > { %1778 = vmatprep.subr.bf16.mxu1 %v1777_v39  ;;  %v1815_v39 = vpack.c.bf16 %v1164_v37, %v1162_v35  ;;  %v1170_v42 = vrot.slane %v1097_v38, 2 }
 0x251   : > { %1780 = vmatpush1.bf16.msra.mxu1 %v1779_v45  ;;  %v1171_v45 = vrot.slane %v2241_v6, 2  ;;  %v1265_v6 = vld [vmem:[%s2338_s4] sm:$0x3] }
 0x252   : > { %1782 = vmatprep.subr.bf16.mxu1 %v1781_v47  ;;  %v1270_v7 = vrot.slane %v1265_v6, %v738_v49 }
 0x253   : > { %v1172_v47 = vsel %vm638_vm1, %v1170_v42, %v1171_v45  ;;  %v1177_v53 = vsel %vm638_vm1, %v1171_v45, %v1176_v50 }
 0x255   : > { %1784 = vmatpush1.bf16.msra.mxu1 %v1783_v55  ;;  %v1283_v55 = vld [vmem:[%s2190_s26 + $0x10] sm:$0xff] }
 0x256   : > { %1786 = vmatprep.subr.bf16.mxu1 %v1785_v56  ;;  %v1282_v56 = vld [vmem:[%s2190_s26 + $0x8] sm:$0xfe]  ;;  %v1294_v59 = vrot.slane %v1283_v55, 1 }
 0x257   : > { %v1296_v13 = vrot.slane %v1282_v56, 1 }
 0x258   : > { %v1295_v1 = vsel %vm396_vm0, %v1293_v58, %v1294_v59 }
 0x259   : > { %1788 = vmatpush1.bf16.msra.mxu1 %v1787_v61  ;;  %v1285_v61 = vld [vmem:[%s2190_s26 + $0x20] sm:$0x1]  ;;  %v1298_v5 = vsel %vm396_vm0, %v1296_v13, %v1297_v60  ;;  %s1961_s26 = scalar_lea.vmem %s1960_s25, 1024 }
 0x25a   : > { %1790 = vmatprep.subr.bf16.mxu1 %v1789_v62  ;;  %v1274_v62 = vrot.slane %v1265_v6, %v742_v51  ;;  %v1299_v2 = vrot.slane %v1285_v61, 1  ;;  %p1963_p7 = scmp.lt.s32.totalorder %s1961_s26, %s1955_s22 }
 0x25c   : > { %v1300_v48 = vsel %vm396_vm0, %v1294_v59, %v1299_v2  ;;  %p1964_p8 = por %p1963_p7, %p1962_p4 }
 0x25d   : > { %1792 = vmatpush1.bf16.msra.mxu1 %v1791_v3 }
 0x25e   : > { %1794 = vmatprep.subr.bf16.mxu1 %v1793_v4  ;;  %p1965_p11 = pnand %p1964_p8, %p1958_p3 }
 0x261   : > { %1796 = vmatpush1.bf16.msra.mxu1 %v1795_v9 }
 0x262   : > { %1798 = vmatprep.subr.bf16.mxu1 %v1797_v10 }
 0x265   : > { %1800 = vmatpush1.bf16.msra.mxu1 %v1799_v15 }
 0x266   : > { %1802 = vmatprep.subr.bf16.mxu1 %v1801_v32 }
 0x269   : > { %1804 = vmatpush1.bf16.msra.mxu1 %v1803_v20 }
 0x26a   : > { %1806 = vmatprep.subr.bf16.mxu1 %v1805_v21 }
 0x26d   : > { %1808 = vmatpush1.bf16.msra.mxu1 %v1807_v26 }
 0x26e   : > { %1810 = vmatprep.subr.bf16.mxu1 %v1809_v27 }
 0x271   : > { %1812 = vmatpush1.bf16.msra.mxu1 %v1811_v33 }
 0x272   : > { %1814 = vmatprep.subr.bf16.mxu1 %v1813_v34 }
 0x275   : > { %1816 = vmatpush1.bf16.msra.mxu1 %v1815_v39 }
 0x278   : > { %1249 = vmatmul.mubr.f32.vlgmr.msra.gmra.mrb[0].mxu1 %v1172_v47 }
 0x279   : > { %1254 = vmatprep.mubr.f32.mxu1 %v1179_v52 }
 0x27c   : > { %1255 = vmatmul.mubr.f32.gmra.mrb[2].mxu1 %v1177_v53 }
 0x34b   : > { %v1250_v0 = vpop.f32.mrb[0].mxu1 }
 0x34c   : > { %v1277_v3 = vadd.f32 %v1270_v7, %v1250_v0  ;;  %v1252_v4 = vpop.f32.mrb[1].mxu1 }
 0x34d   : > { %v1278_v49 = vadd.f32 %v1274_v62, %v1252_v4 }
 0x34e   : > { %v1307_v46 = vadd.f32 %v1295_v1, %v1277_v3 }
 0x34f   : > { %v1308_v36 = vadd.f32 %v1298_v5, %v1278_v49  ;;  %v1256_v9 = vpop.f32.mrb[2].mxu1 }
 0x350   : > { %v1311_v51 = vmax.f32 %v1307_v46, 0.0  ;;  %v1279_v10 = vadd.f32 %v1270_v7, %v1256_v9  ;;  %v1258_v11 = vpop.f32.mrb[3].mxu1 }
 0x351   : > { %v1312_v14 = vmax.f32 %v1308_v36, 0.0  ;;  %v1280_v41 = vadd.f32 %v1274_v62, %v1258_v11 }
 0x352   : > { %1315 = vst [vmem:[%s247_s16] sm:$0xff] %v1311_v51  ;;  %v1309_v15 = vadd.f32 %v1300_v48, %v1279_v10 }
 0x353   : > { %1316 = vst [vmem:[%s247_s16 + $0x8] sm:$0xff] %v1312_v14  ;;  %v1310_v32 = vadd.f32 %v1302_v12, %v1280_v41 }
 0x354   : > { %v1313_v16 = vmax.f32 %v1309_v15, 0.0 }
 0x355   : > { %v1314_v17 = vmax.f32 %v1310_v32, 0.0 }
 0x356   : > { %1317 = vst [vmem:[%s247_s16 + $0x10] sm:$0xff] %v1313_v16 }
 0x357   : > { %1318 = vst [vmem:[%s247_s16 + $0x18] sm:$0xff] %v1314_v17 }
 0x358   : > { %1968 = shalt.err (!%p1965_p11)
}
 0x359   : > { %s1969_s9 = scalar_lea.hbm %s2289_s30, 512  ;;  %s1973_s13 = scalar_lea.hbm %s2339_s5, 1024 }
 0x35a   : > { %p1970_p13 = scmp.ne.s32.totalorder %s2289_s30, %s1969_s9  ;;  %p1974_p6 = scmp.lt.u32.totalorder %s2289_s30, %s2339_s5 }
 0x35b   : > { %p1975_p9 = scmp.lt.u32.totalorder %s1973_s13, %s1969_s9  ;;  %p1977_p10 = scmp.lt.u32.totalorder %s1969_s9, %s2289_s30 }
 0x35c   : > { %p1971_p5 = pnand %p1970_p13, %p2352_p1 }
 0x35d   : > { %p1976_p12 = por %p1975_p9, %p1974_p6 }
 0x35e   : > { %p1972_p0 = pneg %p1971_p5 }
 0x35f   : > { %p1978_p2 = por %p1977_p10, %p1976_p12 }
 0x361   : > { %p1979_p3 = pnand %p1978_p2, %p1972_p0 }
 0x363   : > { %1982 = shalt.err (!%p1979_p3)
}
 0x364   : > { %s2033_s16 = smov 256   ;;  %s2034_s7 = smov 16  }
 0x365   : > { %1842 = dma.vmem_to_hbm [thread:$0]  (%p2352_p1), %s2284_s17, 512, %s2289_s30, %s2293_s8, %s2033_s16, %s2033_s16, %s2034_s7  }
 0x366 PF: > { %p1859_p4 = scmp.ge.s32.totalorder %s2025_s21, 2  ;;  %s1348_s23 = sand.u32 1, %s2013_s18  }
 0x367   : > { %p2353_p7 = scmp.ne.s32.totalorder %s2344_s29, 0  ;;  %s1349_s6 = scalar_lea.sflag [#allocation5], %s1348_s23 }
 0x369   : > { %p1852_p8 = pnand %p1859_p4, %p2353_p7 }
 0x36b   : > { %2008 = dma.done.wait (!%p1852_p8), %s1349_s6, 512  }
 0x36c   : > { %2010 = vsyncadd (!%p1852_p8), %s1349_s6, 4294966784  ;;  %p17_p11 = scmp.ge.s32.totalorder %s2090_s24, 4   ;;  %s2354_s18 = smov %s2017_s19 }
 0x36d   : > { %s2355_s19 = smov %s2021_s20  ;;  %s2356_s20 = smov %s2101_s27 }
 0x36e   : > { %s2357_s21 = smov %s2090_s24  ;;  %19 = sbr.rel (!%p17_p11) target bundleno = 5 (0x5), region = 89 }
 0x375   :  { %1354 = vsyncpa [#allocation4], 1 }
 0x376   :  { %1356 = vsyncpa [#allocation4 + $0x1], 1 }
 0x377   :  { %1357 = vsyncpa [#allocation7], 1 }
 0x378   :  { %1358 = vsyncpa [#allocation5], 1 }
 0x379   :  { %1360 = vsyncpa [#allocation5 + $0x1], 1 }

</bundles_post_ra>
